<compile_context>
chip_gen: v7x
topology: tpu7x:2x2x1
jax: 0.10.0
libtpu: 0.0.40
codegen_flags: <defaults>
</compile_context>

<pallas_src>
import functools

import numpy as np
import jax
import jax.numpy as jnp
from jax import lax
from jax.experimental import pallas as pl
from jax.experimental.pallas import tpu as pltpu


# ----------------------------------------------------------------------------
# Shape helpers
# ----------------------------------------------------------------------------
def _conv_dims(obs_shape):
    C, H, W = obs_shape
    assert C == 4, "module hard-codes 4 input channels"
    oh1 = (H - 8) // 4 + 1
    ow1 = (W - 8) // 4 + 1
    assert oh1 >= 4 and ow1 >= 4, "input too small for the 4x4 stride-2 conv2"
    oh2 = (oh1 - 4) // 2 + 1
    ow2 = (ow1 - 4) // 2 + 1
    return oh1, ow1, oh2, ow2


def _round_up(x, m):
    return (x + m - 1) // m * m


def _choose_bblk(batch):
    """Pick (B_BLK, padded batch): B_BLK <= 128, multiple of 8, grid >= 2 when possible."""
    b8 = _round_up(batch, 8)
    if b8 <= 8:
        return 8, 8
    bblk = min(128, _round_up(-(-b8 // 2), 8))
    return bblk, _round_up(b8, bblk)


# ----------------------------------------------------------------------------
# Wrapper-side layout: stride-blocked cells, bf16, shape (oh1+1, Bpad, ow1*128)
#   value[p, b, q1*4C*8 + c*32 + di*8 + dj] = x[b, c, 4p+di, 4q1+dj]
# ----------------------------------------------------------------------------
def _prep_input(x, oh1, ow1, bpad):
    B, C, H, W = x.shape
    ph = oh1 + 1
    x = x.astype(jnp.bfloat16)                         # 0..255 pixel range: cheap & safe
    if bpad > B:
        x = jnp.pad(x, ((0, bpad - B), (0, 0), (0, 0), (0, 0)))
    x = x[:, :, :4 * ph, :4 * (ow1 + 1)]
    x = x.reshape(bpad, C, ph, 4, ow1 + 1, 4)          # (b, c, p, di, qblk, j)
    left = x[:, :, :, :, 0:ow1, :]                     # dj = j
    right = x[:, :, :, :, 1:ow1 + 1, :]                # dj = 4 + j
    cells = jnp.stack([left, right], axis=5)           # (b, c, p, di, q1, half, j)
    xq = cells.transpose(2, 0, 4, 1, 3, 5, 6)          # (p, b, q1, c, di, half, j)
    return xq.reshape(ph, bpad, ow1 * C * 32)


# ----------------------------------------------------------------------------
# Fused forward kernel: one grid step == B_BLK images, everything stays in VMEM
# ----------------------------------------------------------------------------
def _convnet_kernel(xq_ref, w1a_ref, w1b_ref, b1_ref, w2_ref, b2_ref,
                    wf1_ref, bf1_ref, wf2_ref, bf2_ref, out_ref, *, oh1, oh2):
    f32 = jnp.float32
    bf16 = jnp.bfloat16
    ph, bblk, lin = xq_ref.shape
    o1l = w1a_ref.shape[1]                              # ow1 * 16
    o2l = w2_ref.shape[2]                               # ow2 * 32

    # ---- conv1: two banded matmuls (top/bottom kernel halves); M = ph*B_BLK.
    xw = xq_ref[...].reshape(ph * bblk, lin)            # tile-aligned merge -> free
    ya = jnp.dot(xw, w1a_ref[...], preferred_element_type=f32).reshape(ph, bblk, o1l)
    yb = jnp.dot(xw, w1b_ref[...], preferred_element_type=f32).reshape(ph, bblk, o1l)
    # Vertical tap pairing along the OUTER dim (slab selection -> no relayout).
    h1 = jnp.maximum(ya[0:oh1] + yb[1:ph] + b1_ref[...], 0.0)   # (oh1, B_BLK, ow1*16)
    h1b = h1.astype(bf16).reshape(oh1 * bblk, o1l)

    # ---- conv2: four banded matmuls (one per kernel row di); M = oh1*B_BLK.
    zs = [jnp.dot(h1b, w2_ref[di], preferred_element_type=f32).reshape(oh1, bblk, o2l)
          for di in range(4)]

    # ---- conv2 row-combine + fc1 (accumulated (B_BLK,o2l)@(o2l,256) matmuls)
    acc = None
    for p2 in range(oh2):
        a2 = (zs[0][2 * p2] + zs[1][2 * p2 + 1]
              + zs[2][2 * p2 + 2] + zs[3][2 * p2 + 3])           # (B_BLK, ow2*32)
        h2 = jnp.maximum(a2 + b2_ref[...], 0.0).astype(bf16)
        t = jnp.dot(h2, wf1_ref[p2], preferred_element_type=f32)  # (B_BLK, 256)
        acc = t if acc is None else acc + t
    h3 = jnp.maximum(acc + bf1_ref[...], 0.0).astype(bf16)

    # ---- fc2 into a lane-dense (B_BLK, 128) block (num_actions padded to 128)
    out = jnp.dot(h3, wf2_ref[...], preferred_element_type=f32) + bf2_ref[...]
    out_ref[...] = out.astype(out_ref.dtype)


# ----------------------------------------------------------------------------
# Parameter packing: fold 1/255, build banded weights, pad fc2 to 128 lanes
# ----------------------------------------------------------------------------
def pack_params(params, obs_shape, num_actions, compute_dtype=jnp.bfloat16):
    C, _, _ = obs_shape
    oh1, ow1, oh2, ow2 = _conv_dims(obs_shape)
    # Implicit band invariant: every conv2 tap references a valid conv1 row/col.
    assert 2 * (oh2 - 1) + 3 <= oh1 - 1 and 2 * (ow2 - 1) + 3 <= ow1 - 1
    f32 = np.float32

    # conv1: (O,C,8,8) -> banded (ow1*C*32, ow1*16) for top/bottom kernel halves,
    # with 1/255 folded in.  Lane-in order (q1, c, di, dj); lane-out (q1, o).
    w1 = np.asarray(params["conv1_w"], f32) / 255.0
    o1 = w1.shape[0]
    wa = w1[:, :, 0:4, :].transpose(1, 2, 3, 0).reshape(C * 32, o1)
    wb = w1[:, :, 4:8, :].transpose(1, 2, 3, 0).reshape(C * 32, o1)
    eye = np.eye(ow1, dtype=f32)
    w1a = np.kron(eye, wa)                              # (ow1*C*32, ow1*o1)
    w1b = np.kron(eye, wb)
    b1 = np.tile(np.asarray(params["conv1_b"], f32), ow1).reshape(1, 1, ow1 * o1)

    # conv2: (O,C,4,4) -> 4 banded (ow1*16, ow2*32) matrices, one per kernel row.
    w2 = np.asarray(params["conv2_w"], f32)
    o2, c2 = w2.shape[0], w2.shape[1]
    w2band = np.zeros((4, ow1 * c2, ow2 * o2), f32)
    for di in range(4):
        for q2 in range(ow2):
            for dj in range(4):
                q1 = 2 * q2 + dj
                w2band[di, q1 * c2:(q1 + 1) * c2, q2 * o2:(q2 + 1) * o2] = \
                    w2[:, :, di, dj].T
    b2 = np.tile(np.asarray(params["conv2_b"], f32), ow2).reshape(1, ow2 * o2)

    # fc1: columns permuted from NCHW flatten order to (p2, q2, oc) / lane order.
    wf1 = np.asarray(params["fc1_w"], f32)               # (256, o2*oh2*ow2)
    n1 = wf1.shape[0]
    wf1p = (wf1.reshape(n1, o2, oh2, ow2)
               .transpose(2, 3, 1, 0)
               .reshape(oh2, ow2 * o2, n1))

    bf1 = np.asarray(params["fc1_b"], f32).reshape(1, n1)

    # fc2: pre-transpose and lane-pad num_actions to a multiple of 128.
    A = num_actions
    AP = max(128, _round_up(A, 128))
    wf2 = np.zeros((n1, AP), f32)
    wf2[:, :A] = np.asarray(params["fc2_w"], f32).T
    bf2 = np.zeros((1, AP), f32)
    bf2[0, :A] = np.asarray(params["fc2_b"], f32)

    packed = dict(
        w1a=jnp.asarray(w1a, compute_dtype),
        w1b=jnp.asarray(w1b, compute_dtype),
        b1=jnp.asarray(b1),
        w2=jnp.asarray(w2band, compute_dtype),
        b2=jnp.asarray(b2),
        wf1=jnp.asarray(wf1p, compute_dtype),
        bf1=jnp.asarray(bf1),
        wf2=jnp.asarray(wf2, compute_dtype),
        bf2=jnp.asarray(bf2),
    )
    return packed, (oh1, ow1, oh2, ow2)


# ----------------------------------------------------------------------------
# Forward: single fused pallas_call, batch-tiled grid
# ----------------------------------------------------------------------------
def convnet_forward(packed, x, *, dims, num_actions):
    oh1, ow1, oh2, ow2 = dims
    B, C = x.shape[0], x.shape[1]
    bblk, bpad = _choose_bblk(B)
    xq = _prep_input(x, oh1, ow1, bpad)                 # (oh1+1, Bpad, ow1*C*32) bf16
    ph = oh1 + 1
    lin = ow1 * C * 32
    o1l = ow1 * 16
    o2l = ow2 * 32
    n1 = packed["wf1"].shape[2]
    AP = packed["wf2"].shape[1]
    nb = bpad // bblk

    kernel = functools.partial(_convnet_kernel, oh1=oh1, oh2=oh2)

    flops = (2 * 2 * (ph * bpad) * lin * o1l            # conv1 (banded)
             + 2 * 4 * (oh1 * bpad) * o1l * o2l         # conv2 (banded)
             + 2 * oh2 * bpad * o2l * n1                # fc1
             + 2 * bpad * n1 * AP)                      # fc2 (lane-padded)
    param_bytes = sum(int(np.prod(v.shape)) * v.dtype.itemsize for v in packed.values())
    bytes_accessed = int(np.prod(xq.shape)) * 2 + bpad * AP * 4 + param_bytes

    out = pl.pallas_call(
        kernel,
        out_shape=jax.ShapeDtypeStruct((bpad, AP), jnp.float32),
        grid=(nb,),
        in_specs=[
            pl.BlockSpec((ph, bblk, lin), lambda b: (0, b, 0)),
            pl.BlockSpec(packed["w1a"].shape, lambda b: (0, 0)),
            pl.BlockSpec(packed["w1b"].shape, lambda b: (0, 0)),
            pl.BlockSpec(packed["b1"].shape, lambda b: (0, 0, 0)),
            pl.BlockSpec(packed["w2"].shape, lambda b: (0, 0, 0)),
            pl.BlockSpec(packed["b2"].shape, lambda b: (0, 0)),
            pl.BlockSpec(packed["wf1"].shape, lambda b: (0, 0, 0)),
            pl.BlockSpec(packed["bf1"].shape, lambda b: (0, 0)),
            pl.BlockSpec(packed["wf2"].shape, lambda b: (0, 0)),
            pl.BlockSpec(packed["bf2"].shape, lambda b: (0, 0)),
        ],
        out_specs=pl.BlockSpec((bblk, AP), lambda b: (b, 0)),
        compiler_params=pltpu.CompilerParams(
            dimension_semantics=("parallel",),
            vmem_limit_bytes=48 * 1024 * 1024),
        cost_estimate=pl.CostEstimate(
            flops=int(flops), transcendentals=0,
            bytes_accessed=int(bytes_accessed)),
    )(xq, packed["w1a"], packed["w1b"], packed["b1"], packed["w2"],
      packed["b2"], packed["wf1"], packed["bf1"], packed["wf2"], packed["bf2"])
    return out[:B, :num_actions]


# ----------------------------------------------------------------------------
# Parameter init (PyTorch default layout / init) + pure-JAX reference
# ----------------------------------------------------------------------------
def init_convnet_params(key, obs_shape, num_actions):
    oh1, ow1, oh2, ow2 = _conv_dims(obs_shape)
    first_linear = 32 * oh2 * ow2

    def uniform(key, shape, fan_in):
        bound = 1.0 / jnp.sqrt(jnp.float32(fan_in))
        return jax.random.uniform(key, shape, jnp.float32, -bound, bound)

    ks = jax.random.split(key, 8)
    params = {
        "conv1_w": uniform(ks[0], (16, 4, 8, 8), 4 * 8 * 8),
        "conv1_b": uniform(ks[1], (16,), 4 * 8 * 8),
        "conv2_w": uniform(ks[2], (32, 16, 4, 4), 16 * 4 * 4),
        "conv2_b": uniform(ks[3], (32,), 16 * 4 * 4),
        "fc1_w": uniform(ks[4], (256, first_linear), first_linear),
        "fc1_b": uniform(ks[5], (256,), first_linear),
        "fc2_w": uniform(ks[6], (num_actions, 256), 256),
        "fc2_b": uniform(ks[7], (num_actions,), 256),
    }
    return params, first_linear


def convnet_reference(params, x):
    x = x.astype(jnp.float32) / 255.0

    def conv(x, w, b, stride):
        y = lax.conv_general_dilated(
            x, w, window_strides=stride, padding="VALID",
            dimension_numbers=("NCHW", "OIHW", "NCHW"))
        return y + b.reshape(1, -1, 1, 1)

    h = jnp.maximum(conv(x, params["conv1_w"], params["conv1_b"], (4, 4)), 0.0)
    h = jnp.maximum(conv(h, params["conv2_w"], params["conv2_b"], (2, 2)), 0.0)
    h = h.reshape(h.shape[0], -1)
    h = jnp.maximum(h @ params["fc1_w"].T + params["fc1_b"], 0.0)
    return h @ params["fc2_w"].T + params["fc2_b"]


if __name__ == "__main__":
    # obs_shape=(4,36,36): conv1 -> 16x8x8, conv2 -> 32x3x3, first_linear=288.
    obs_shape = (4, 36, 36)
    num_actions = 6
    batch = 2

    key = jax.random.PRNGKey(0)
    k_params, k_x = jax.random.split(key)
    params, first_linear = init_convnet_params(k_params, obs_shape, num_actions)
    assert first_linear == 288, first_linear

    packed, dims = pack_params(params, obs_shape, num_actions)
    x = jax.random.uniform(k_x, (batch,) + obs_shape, jnp.float32, 0.0, 255.0)

    fwd = jax.jit(functools.partial(convnet_forward, dims=dims,
                                    num_actions=num_actions))
    out = jax.block_until_ready(fwd(packed, x))
    assert out.shape == (batch, num_actions), out.shape

    ref = jax.block_until_ready(convnet_reference(params, x))
    max_err = float(jnp.max(jnp.abs(out - ref)))
    # bf16 MXU operands => relaxed tolerance vs the f32 reference.
    assert jnp.allclose(out, ref, rtol=2e-2, atol=2e-2), ("mismatch", max_err)

    print("KERNEL_OK")
</pallas_src>

<mosaic_0001>
module attributes {stable_mosaic.version = 11 : i64} {
  func.func @_convnet_kernel(%arg0: i32, %arg1: memref<9x8x1024xbf16, #tpu.memory_space<vmem>>, %arg2: memref<1024x128xbf16, #tpu.memory_space<vmem>>, %arg3: memref<1024x128xbf16, #tpu.memory_space<vmem>>, %arg4: memref<1x1x128xf32, #tpu.memory_space<vmem>>, %arg5: memref<4x128x96xbf16, #tpu.memory_space<vmem>>, %arg6: memref<1x96xf32, #tpu.memory_space<vmem>>, %arg7: memref<3x96x256xbf16, #tpu.memory_space<vmem>>, %arg8: memref<1x256xf32, #tpu.memory_space<vmem>>, %arg9: memref<256x128xbf16, #tpu.memory_space<vmem>>, %arg10: memref<1x128xf32, #tpu.memory_space<vmem>>, %arg11: memref<8x128xf32, #tpu.memory_space<vmem>>) attributes {dimension_semantics = [#tpu.dimension_semantics<parallel>], iteration_bounds = array<i64: 1>, scalar_prefetch = 0 : i64, scratch_operands = 0 : i64, tpu.core_type = #tpu.core_type<tc>, window_params = [{transform_indices = @transform_0, window_bounds = array<i64: 9, 8, 1024>}, {pipeline_mode = #tpu.pipeline_mode<synchronous>, transform_indices = @transform_1, window_bounds = array<i64: 1024, 128>}, {pipeline_mode = #tpu.pipeline_mode<synchronous>, transform_indices = @transform_2, window_bounds = array<i64: 1024, 128>}, {pipeline_mode = #tpu.pipeline_mode<synchronous>, transform_indices = @transform_3, window_bounds = array<i64: 1, 1, 128>}, {pipeline_mode = #tpu.pipeline_mode<synchronous>, transform_indices = @transform_4, window_bounds = array<i64: 4, 128, 96>}, {pipeline_mode = #tpu.pipeline_mode<synchronous>, transform_indices = @transform_5, window_bounds = array<i64: 1, 96>}, {pipeline_mode = #tpu.pipeline_mode<synchronous>, transform_indices = @transform_6, window_bounds = array<i64: 3, 96, 256>}, {pipeline_mode = #tpu.pipeline_mode<synchronous>, transform_indices = @transform_7, window_bounds = array<i64: 1, 256>}, {pipeline_mode = #tpu.pipeline_mode<synchronous>, transform_indices = @transform_8, window_bounds = array<i64: 256, 128>}, {pipeline_mode = #tpu.pipeline_mode<synchronous>, transform_indices = @transform_9, window_bounds = array<i64: 1, 128>}, {transform_indices = @transform_10, window_bounds = array<i64: 8, 128>}]} {
    %c0 = arith.constant 0 : index
    %c0_0 = arith.constant 0 : index
    %c0_1 = arith.constant 0 : index
    %0 = vector.load %arg1[%c0, %c0_0, %c0_1] : memref<9x8x1024xbf16, #tpu.memory_space<vmem>>, vector<9x8x1024xbf16>
    %1 = vector.shape_cast %0 : vector<9x8x1024xbf16> to vector<72x1024xbf16>
    %c0_2 = arith.constant 0 : index
    %c0_3 = arith.constant 0 : index
    %2 = vector.load %arg2[%c0_2, %c0_3] : memref<1024x128xbf16, #tpu.memory_space<vmem>>, vector<1024x128xbf16>
    %cst = arith.constant dense<0.000000e+00> : vector<72x128xf32>
    %3 = tpu.matmul %1, %2, %cst {dimension_numbers = #tpu.dot_dimension_numbers<[1], [0], [0], [1], [0, 0, 1, 1], [], []>} : vector<72x1024xbf16>, vector<1024x128xbf16>, vector<72x128xf32> -> vector<72x128xf32>
    %4 = vector.shape_cast %3 : vector<72x128xf32> to vector<9x8x128xf32>
    %c0_4 = arith.constant 0 : index
    %c0_5 = arith.constant 0 : index
    %5 = vector.load %arg3[%c0_4, %c0_5] : memref<1024x128xbf16, #tpu.memory_space<vmem>>, vector<1024x128xbf16>
    %cst_6 = arith.constant dense<0.000000e+00> : vector<72x128xf32>
    %6 = tpu.matmul %1, %5, %cst_6 {dimension_numbers = #tpu.dot_dimension_numbers<[1], [0], [0], [1], [0, 0, 1, 1], [], []>} : vector<72x1024xbf16>, vector<1024x128xbf16>, vector<72x128xf32> -> vector<72x128xf32>
    %7 = vector.shape_cast %6 : vector<72x128xf32> to vector<9x8x128xf32>
    %8 = vector.extract_strided_slice %4 {offsets = [0, 0, 0], sizes = [8, 8, 128], strides = [1, 1, 1]} : vector<9x8x128xf32> to vector<8x8x128xf32>
    %9 = vector.extract_strided_slice %7 {offsets = [1, 0, 0], sizes = [8, 8, 128], strides = [1, 1, 1]} : vector<9x8x128xf32> to vector<8x8x128xf32>
    %10 = arith.addf %8, %9 : vector<8x8x128xf32>
    %c0_7 = arith.constant 0 : index
    %c0_8 = arith.constant 0 : index
    %c0_9 = arith.constant 0 : index
    %11 = vector.load %arg4[%c0_7, %c0_8, %c0_9] : memref<1x1x128xf32, #tpu.memory_space<vmem>>, vector<1x1x128xf32>
    %12 = vector.broadcast %11 : vector<1x1x128xf32> to vector<8x8x128xf32>
    %13 = arith.addf %10, %12 : vector<8x8x128xf32>
    %cst_10 = arith.constant 0.000000e+00 : f32
    %14 = vector.broadcast %cst_10 : f32 to vector<8x8x128xf32>
    %15 = arith.maximumf %13, %14 : vector<8x8x128xf32>
    %16 = arith.truncf %15 : vector<8x8x128xf32> to vector<8x8x128xbf16>
    %17 = vector.shape_cast %16 : vector<8x8x128xbf16> to vector<64x128xbf16>
    %c0_11 = arith.constant 0 : index
    %c0_12 = arith.constant 0 : index
    %c0_13 = arith.constant 0 : index
    %18 = vector.load %arg5[%c0_11, %c0_12, %c0_13] : memref<4x128x96xbf16, #tpu.memory_space<vmem>>, vector<1x128x96xbf16>
    %19 = vector.shape_cast %18 : vector<1x128x96xbf16> to vector<128x96xbf16>
    %cst_14 = arith.constant dense<0.000000e+00> : vector<64x96xf32>
    %20 = tpu.matmul %17, %19, %cst_14 {dimension_numbers = #tpu.dot_dimension_numbers<[1], [0], [0], [1], [0, 0, 1, 1], [], []>} : vector<64x128xbf16>, vector<128x96xbf16>, vector<64x96xf32> -> vector<64x96xf32>
    %21 = vector.shape_cast %20 : vector<64x96xf32> to vector<8x8x96xf32>
    %c1 = arith.constant 1 : index
    %c0_15 = arith.constant 0 : index
    %c0_16 = arith.constant 0 : index
    %22 = vector.load %arg5[%c1, %c0_15, %c0_16] : memref<4x128x96xbf16, #tpu.memory_space<vmem>>, vector<1x128x96xbf16>
    %23 = vector.shape_cast %22 : vector<1x128x96xbf16> to vector<128x96xbf16>
    %cst_17 = arith.constant dense<0.000000e+00> : vector<64x96xf32>
    %24 = tpu.matmul %17, %23, %cst_17 {dimension_numbers = #tpu.dot_dimension_numbers<[1], [0], [0], [1], [0, 0, 1, 1], [], []>} : vector<64x128xbf16>, vector<128x96xbf16>, vector<64x96xf32> -> vector<64x96xf32>
    %25 = vector.shape_cast %24 : vector<64x96xf32> to vector<8x8x96xf32>
    %c2 = arith.constant 2 : index
    %c0_18 = arith.constant 0 : index
    %c0_19 = arith.constant 0 : index
    %26 = vector.load %arg5[%c2, %c0_18, %c0_19] : memref<4x128x96xbf16, #tpu.memory_space<vmem>>, vector<1x128x96xbf16>
    %27 = vector.shape_cast %26 : vector<1x128x96xbf16> to vector<128x96xbf16>
    %cst_20 = arith.constant dense<0.000000e+00> : vector<64x96xf32>
    %28 = tpu.matmul %17, %27, %cst_20 {dimension_numbers = #tpu.dot_dimension_numbers<[1], [0], [0], [1], [0, 0, 1, 1], [], []>} : vector<64x128xbf16>, vector<128x96xbf16>, vector<64x96xf32> -> vector<64x96xf32>
    %29 = vector.shape_cast %28 : vector<64x96xf32> to vector<8x8x96xf32>
    %c3 = arith.constant 3 : index
    %c0_21 = arith.constant 0 : index
    %c0_22 = arith.constant 0 : index
    %30 = vector.load %arg5[%c3, %c0_21, %c0_22] : memref<4x128x96xbf16, #tpu.memory_space<vmem>>, vector<1x128x96xbf16>
    %31 = vector.shape_cast %30 : vector<1x128x96xbf16> to vector<128x96xbf16>
    %cst_23 = arith.constant dense<0.000000e+00> : vector<64x96xf32>
    %32 = tpu.matmul %17, %31, %cst_23 {dimension_numbers = #tpu.dot_dimension_numbers<[1], [0], [0], [1], [0, 0, 1, 1], [], []>} : vector<64x128xbf16>, vector<128x96xbf16>, vector<64x96xf32> -> vector<64x96xf32>
    %33 = vector.shape_cast %32 : vector<64x96xf32> to vector<8x8x96xf32>
    %34 = vector.extract_strided_slice %21 {offsets = [0, 0, 0], sizes = [1, 8, 96], strides = [1, 1, 1]} : vector<8x8x96xf32> to vector<1x8x96xf32>
    %35 = vector.shape_cast %34 : vector<1x8x96xf32> to vector<8x96xf32>
    %36 = vector.extract_strided_slice %25 {offsets = [1, 0, 0], sizes = [1, 8, 96], strides = [1, 1, 1]} : vector<8x8x96xf32> to vector<1x8x96xf32>
    %37 = vector.shape_cast %36 : vector<1x8x96xf32> to vector<8x96xf32>
    %38 = arith.addf %35, %37 : vector<8x96xf32>
    %39 = vector.extract_strided_slice %29 {offsets = [2, 0, 0], sizes = [1, 8, 96], strides = [1, 1, 1]} : vector<8x8x96xf32> to vector<1x8x96xf32>
    %40 = vector.shape_cast %39 : vector<1x8x96xf32> to vector<8x96xf32>
    %41 = arith.addf %38, %40 : vector<8x96xf32>
    %42 = vector.extract_strided_slice %33 {offsets = [3, 0, 0], sizes = [1, 8, 96], strides = [1, 1, 1]} : vector<8x8x96xf32> to vector<1x8x96xf32>
    %43 = vector.shape_cast %42 : vector<1x8x96xf32> to vector<8x96xf32>
    %44 = arith.addf %41, %43 : vector<8x96xf32>
    %c0_24 = arith.constant 0 : index
    %c0_25 = arith.constant 0 : index
    %45 = vector.load %arg6[%c0_24, %c0_25] : memref<1x96xf32, #tpu.memory_space<vmem>>, vector<1x96xf32>
    %46 = vector.broadcast %45 : vector<1x96xf32> to vector<8x96xf32>
    %47 = arith.addf %44, %46 : vector<8x96xf32>
    %cst_26 = arith.constant 0.000000e+00 : f32
    %48 = vector.broadcast %cst_26 : f32 to vector<8x96xf32>
    %49 = arith.maximumf %47, %48 : vector<8x96xf32>
    %50 = arith.truncf %49 : vector<8x96xf32> to vector<8x96xbf16>
    %c0_27 = arith.constant 0 : index
    %c0_28 = arith.constant 0 : index
    %c0_29 = arith.constant 0 : index
    %51 = vector.load %arg7[%c0_27, %c0_28, %c0_29] : memref<3x96x256xbf16, #tpu.memory_space<vmem>>, vector<1x96x256xbf16>
    %52 = vector.shape_cast %51 : vector<1x96x256xbf16> to vector<96x256xbf16>
    %cst_30 = arith.constant dense<0.000000e+00> : vector<8x256xf32>
    %53 = tpu.matmul %50, %52, %cst_30 {dimension_numbers = #tpu.dot_dimension_numbers<[1], [0], [0], [1], [0, 0, 1, 1], [], []>} : vector<8x96xbf16>, vector<96x256xbf16>, vector<8x256xf32> -> vector<8x256xf32>
    %54 = vector.extract_strided_slice %21 {offsets = [2, 0, 0], sizes = [1, 8, 96], strides = [1, 1, 1]} : vector<8x8x96xf32> to vector<1x8x96xf32>
    %55 = vector.shape_cast %54 : vector<1x8x96xf32> to vector<8x96xf32>
    %56 = vector.extract_strided_slice %25 {offsets = [3, 0, 0], sizes = [1, 8, 96], strides = [1, 1, 1]} : vector<8x8x96xf32> to vector<1x8x96xf32>
    %57 = vector.shape_cast %56 : vector<1x8x96xf32> to vector<8x96xf32>
    %58 = arith.addf %55, %57 : vector<8x96xf32>
    %59 = vector.extract_strided_slice %29 {offsets = [4, 0, 0], sizes = [1, 8, 96], strides = [1, 1, 1]} : vector<8x8x96xf32> to vector<1x8x96xf32>
    %60 = vector.shape_cast %59 : vector<1x8x96xf32> to vector<8x96xf32>
    %61 = arith.addf %58, %60 : vector<8x96xf32>
    %62 = vector.extract_strided_slice %33 {offsets = [5, 0, 0], sizes = [1, 8, 96], strides = [1, 1, 1]} : vector<8x8x96xf32> to vector<1x8x96xf32>
    %63 = vector.shape_cast %62 : vector<1x8x96xf32> to vector<8x96xf32>
    %64 = arith.addf %61, %63 : vector<8x96xf32>
    %c0_31 = arith.constant 0 : index
    %c0_32 = arith.constant 0 : index
    %65 = vector.load %arg6[%c0_31, %c0_32] : memref<1x96xf32, #tpu.memory_space<vmem>>, vector<1x96xf32>
    %66 = vector.broadcast %65 : vector<1x96xf32> to vector<8x96xf32>
    %67 = arith.addf %64, %66 : vector<8x96xf32>
    %cst_33 = arith.constant 0.000000e+00 : f32
    %68 = vector.broadcast %cst_33 : f32 to vector<8x96xf32>
    %69 = arith.maximumf %67, %68 : vector<8x96xf32>
    %70 = arith.truncf %69 : vector<8x96xf32> to vector<8x96xbf16>
    %c1_34 = arith.constant 1 : index
    %c0_35 = arith.constant 0 : index
    %c0_36 = arith.constant 0 : index
    %71 = vector.load %arg7[%c1_34, %c0_35, %c0_36] : memref<3x96x256xbf16, #tpu.memory_space<vmem>>, vector<1x96x256xbf16>
    %72 = vector.shape_cast %71 : vector<1x96x256xbf16> to vector<96x256xbf16>
    %cst_37 = arith.constant dense<0.000000e+00> : vector<8x256xf32>
    %73 = tpu.matmul %70, %72, %cst_37 {dimension_numbers = #tpu.dot_dimension_numbers<[1], [0], [0], [1], [0, 0, 1, 1], [], []>} : vector<8x96xbf16>, vector<96x256xbf16>, vector<8x256xf32> -> vector<8x256xf32>
    %74 = arith.addf %53, %73 : vector<8x256xf32>
    %75 = vector.extract_strided_slice %21 {offsets = [4, 0, 0], sizes = [1, 8, 96], strides = [1, 1, 1]} : vector<8x8x96xf32> to vector<1x8x96xf32>
    %76 = vector.shape_cast %75 : vector<1x8x96xf32> to vector<8x96xf32>
    %77 = vector.extract_strided_slice %25 {offsets = [5, 0, 0], sizes = [1, 8, 96], strides = [1, 1, 1]} : vector<8x8x96xf32> to vector<1x8x96xf32>
    %78 = vector.shape_cast %77 : vector<1x8x96xf32> to vector<8x96xf32>
    %79 = arith.addf %76, %78 : vector<8x96xf32>
    %80 = vector.extract_strided_slice %29 {offsets = [6, 0, 0], sizes = [1, 8, 96], strides = [1, 1, 1]} : vector<8x8x96xf32> to vector<1x8x96xf32>
    %81 = vector.shape_cast %80 : vector<1x8x96xf32> to vector<8x96xf32>
    %82 = arith.addf %79, %81 : vector<8x96xf32>
    %83 = vector.extract_strided_slice %33 {offsets = [7, 0, 0], sizes = [1, 8, 96], strides = [1, 1, 1]} : vector<8x8x96xf32> to vector<1x8x96xf32>
    %84 = vector.shape_cast %83 : vector<1x8x96xf32> to vector<8x96xf32>
    %85 = arith.addf %82, %84 : vector<8x96xf32>
    %c0_38 = arith.constant 0 : index
    %c0_39 = arith.constant 0 : index
    %86 = vector.load %arg6[%c0_38, %c0_39] : memref<1x96xf32, #tpu.memory_space<vmem>>, vector<1x96xf32>
    %87 = vector.broadcast %86 : vector<1x96xf32> to vector<8x96xf32>
    %88 = arith.addf %85, %87 : vector<8x96xf32>
    %cst_40 = arith.constant 0.000000e+00 : f32
    %89 = vector.broadcast %cst_40 : f32 to vector<8x96xf32>
    %90 = arith.maximumf %88, %89 : vector<8x96xf32>
    %91 = arith.truncf %90 : vector<8x96xf32> to vector<8x96xbf16>
    %c2_41 = arith.constant 2 : index
    %c0_42 = arith.constant 0 : index
    %c0_43 = arith.constant 0 : index
    %92 = vector.load %arg7[%c2_41, %c0_42, %c0_43] : memref<3x96x256xbf16, #tpu.memory_space<vmem>>, vector<1x96x256xbf16>
    %93 = vector.shape_cast %92 : vector<1x96x256xbf16> to vector<96x256xbf16>
    %cst_44 = arith.constant dense<0.000000e+00> : vector<8x256xf32>
    %94 = tpu.matmul %91, %93, %cst_44 {dimension_numbers = #tpu.dot_dimension_numbers<[1], [0], [0], [1], [0, 0, 1, 1], [], []>} : vector<8x96xbf16>, vector<96x256xbf16>, vector<8x256xf32> -> vector<8x256xf32>
    %95 = arith.addf %74, %94 : vector<8x256xf32>
    %c0_45 = arith.constant 0 : index
    %c0_46 = arith.constant 0 : index
    %96 = vector.load %arg8[%c0_45, %c0_46] : memref<1x256xf32, #tpu.memory_space<vmem>>, vector<1x256xf32>
    %97 = vector.broadcast %96 : vector<1x256xf32> to vector<8x256xf32>
    %98 = arith.addf %95, %97 : vector<8x256xf32>
    %cst_47 = arith.constant 0.000000e+00 : f32
    %99 = vector.broadcast %cst_47 : f32 to vector<8x256xf32>
    %100 = arith.maximumf %98, %99 : vector<8x256xf32>
    %101 = arith.truncf %100 : vector<8x256xf32> to vector<8x256xbf16>
    %c0_48 = arith.constant 0 : index
    %c0_49 = arith.constant 0 : index
    %102 = vector.load %arg9[%c0_48, %c0_49] : memref<256x128xbf16, #tpu.memory_space<vmem>>, vector<256x128xbf16>
    %cst_50 = arith.constant dense<0.000000e+00> : vector<8x128xf32>
    %103 = tpu.matmul %101, %102, %cst_50 {dimension_numbers = #tpu.dot_dimension_numbers<[1], [0], [0], [1], [0, 0, 1, 1], [], []>} : vector<8x256xbf16>, vector<256x128xbf16>, vector<8x128xf32> -> vector<8x128xf32>
    %c0_51 = arith.constant 0 : index
    %c0_52 = arith.constant 0 : index
    %104 = vector.load %arg10[%c0_51, %c0_52] : memref<1x128xf32, #tpu.memory_space<vmem>>, vector<1x128xf32>
    %105 = vector.broadcast %104 : vector<1x128xf32> to vector<8x128xf32>
    %106 = arith.addf %103, %105 : vector<8x128xf32>
    %c0_53 = arith.constant 0 : index
    %c0_54 = arith.constant 0 : index
    %107 = vector.load %arg11[%c0_53, %c0_54] : memref<8x128xf32, #tpu.memory_space<vmem>>, vector<8x128xf32>
    tpu.vector_store %arg11[%c0_53, %c0_54], %106 {strides = array<i32>} : memref<8x128xf32, #tpu.memory_space<vmem>>, vector<8x128xf32>,
    return
  }
  func.func @transform_0(%arg0: i32) -> (i32, i32, i32) {
    %c0_i32 = arith.constant 0 : i32
    %c0_i32_0 = arith.constant 0 : i32
    %c0_i32_1 = arith.constant 0 : i32
    return %c0_i32, %arg0, %c0_i32_0 : i32, i32, i32
  }
  func.func @transform_1(%arg0: i32) -> (i32, i32) {
    %c0_i32 = arith.constant 0 : i32
    %c0_i32_0 = arith.constant 0 : i32
    %c0_i32_1 = arith.constant 0 : i32
    return %c0_i32, %c0_i32_0 : i32, i32
  }
  func.func @transform_2(%arg0: i32) -> (i32, i32) {
    %c0_i32 = arith.constant 0 : i32
    %c0_i32_0 = arith.constant 0 : i32
    %c0_i32_1 = arith.constant 0 : i32
    return %c0_i32, %c0_i32_0 : i32, i32
  }
  func.func @transform_3(%arg0: i32) -> (i32, i32, i32) {
    %c0_i32 = arith.constant 0 : i32
    %c0_i32_0 = arith.constant 0 : i32
    %c0_i32_1 = arith.constant 0 : i32
    %c0_i32_2 = arith.constant 0 : i32
    return %c0_i32, %c0_i32_0, %c0_i32_1 : i32, i32, i32
  }
  func.func @transform_4(%arg0: i32) -> (i32, i32, i32) {
    %c0_i32 = arith.constant 0 : i32
    %c0_i32_0 = arith.constant 0 : i32
    %c0_i32_1 = arith.constant 0 : i32
    %c0_i32_2 = arith.constant 0 : i32
    return %c0_i32, %c0_i32_0, %c0_i32_1 : i32, i32, i32
  }
  func.func @transform_5(%arg0: i32) -> (i32, i32) {
    %c0_i32 = arith.constant 0 : i32
    %c0_i32_0 = arith.constant 0 : i32
    %c0_i32_1 = arith.constant 0 : i32
    return %c0_i32, %c0_i32_0 : i32, i32
  }
  func.func @transform_6(%arg0: i32) -> (i32, i32, i32) {
    %c0_i32 = arith.constant 0 : i32
    %c0_i32_0 = arith.constant 0 : i32
    %c0_i32_1 = arith.constant 0 : i32
    %c0_i32_2 = arith.constant 0 : i32
    return %c0_i32, %c0_i32_0, %c0_i32_1 : i32, i32, i32
  }
  func.func @transform_7(%arg0: i32) -> (i32, i32) {
    %c0_i32 = arith.constant 0 : i32
    %c0_i32_0 = arith.constant 0 : i32
    %c0_i32_1 = arith.constant 0 : i32
    return %c0_i32, %c0_i32_0 : i32, i32
  }
  func.func @transform_8(%arg0: i32) -> (i32, i32) {
    %c0_i32 = arith.constant 0 : i32
    %c0_i32_0 = arith.constant 0 : i32
    %c0_i32_1 = arith.constant 0 : i32
    return %c0_i32, %c0_i32_0 : i32, i32
  }
  func.func @transform_9(%arg0: i32) -> (i32, i32) {
    %c0_i32 = arith.constant 0 : i32
    %c0_i32_0 = arith.constant 0 : i32
    %c0_i32_1 = arith.constant 0 : i32
    return %c0_i32, %c0_i32_0 : i32, i32
  }
  func.func @transform_10(%arg0: i32) -> (i32, i32) {
    %c0_i32 = arith.constant 0 : i32
    %c0_i32_0 = arith.constant 0 : i32
    return %arg0, %c0_i32 : i32, i32
  }
}

</mosaic_0001>

<bundles_post_ra>
// kernel: convnet_forward.1
= control target key start
LH: loop header
LB: loop body
LE: loop exit
PB: predicated region body
PF: predicated region fallthrough
CT: control target
= control target key end

     0   :  { %vm2518_vm0 = vcmask 785408   ;;  %s5184_s1 = inlined_call_operand.vmem [shape: bf16[1024,128], index: 1, kind: input, shape index: {}]   ;;  %s5185_s0 = inlined_call_operand.vmem [shape: bf16[9,8,1024], index: 0, kind: input, shape index: {}]   ;;  %s5186_s2 = inlined_call_operand.vmem [shape: bf16[1024,128], index: 2, kind: input, shape index: {}]   ;;  %s5187_s4 = inlined_call_operand.vmem [shape: bf16[4,128,96], index: 4, kind: input, shape index: {}]   ;;  %s5188_s3 = inlined_call_operand.vmem [shape: f32[1,1,128], index: 3, kind: input, shape index: {}]   ;;  %s5189_s6 = inlined_call_operand.vmem [shape: bf16[3,96,256], index: 6, kind: input, shape index: {}]   ;;  %s5190_s5 = inlined_call_operand.vmem [shape: f32[1,96], index: 5, kind: input, shape index: {}]   ;;  %s5191_s8 = inlined_call_operand.vmem [shape: bf16[256,128], index: 8, kind: input, shape index: {}]   ;;  %s5192_s7 = inlined_call_operand.vmem [shape: f32[1,256], index: 7, kind: input, shape index: {}]   ;;  %s5193_s9 = inlined_call_operand.vmem [shape: f32[1,128], index: 9, kind: input, shape index: {}]   ;;  %s5194_s10 = inlined_call_operand.vmem [shape: f32[8,128], index: 10, kind: output, shape index: {}]  }
   0x1   :  { %v3863_v0 = vld [vmem:[%s5184_s1 + $0x40] sm:$0xff]   ;;  %v3867_v4 = vld [vmem:[%s5184_s1 + $0x48] sm:$0xff]   ;;  %v3871_v8 = vld [vmem:[%s5184_s1 + $0x50] sm:$0xff]  }
   0x2   :  { %v3864_v1 = vld [vmem:[%s5184_s1 + $0xc0] sm:$0xff]   ;;  %3328 = vmatprep.subr.bf16.mxu0 %v3863_v0  ;;  %v3868_v5 = vld [vmem:[%s5184_s1 + $0xc8] sm:$0xff]   ;;  %v3872_v9 = vld [vmem:[%s5184_s1 + $0xd0] sm:$0xff]  }
   0x3   :  { %v3865_v2 = vld [vmem:[%s5184_s1] sm:$0xff]   ;;  %3374 = vmatprep.subr.bf16.mxu1 %v3864_v1  ;;  %v3869_v6 = vld [vmem:[%s5184_s1 + $0x8] sm:$0xff]   ;;  %v3873_v10 = vld [vmem:[%s5184_s1 + $0x10] sm:$0xff]  }
   0x4   :  { %v3866_v3 = vld [vmem:[%s5184_s1 + $0x80] sm:$0xff]   ;;  %3329 = vmatpush3.bf16.msra.mxu0 %v3865_v2  ;;  %v3870_v7 = vld [vmem:[%s5184_s1 + $0x88] sm:$0xff]   ;;  %v3874_v11 = vld [vmem:[%s5184_s1 + $0x90] sm:$0xff]  }
   0x5   :  { %3375 = vmatpush3.bf16.msra.mxu1 %v3866_v3  ;;  %3330 = vmatprep.subr.bf16.mxu0 %v3867_v4  ;;  %v3875_v12 = vld [vmem:[%s5184_s1 + $0x58] sm:$0xff]   ;;  %v3879_v16 = vld [vmem:[%s5184_s1 + $0x60] sm:$0xff]   ;;  %v3883_v20 = vld [vmem:[%s5184_s1 + $0x68] sm:$0xff]  }
   0x6   :  { %3376 = vmatprep.subr.bf16.mxu1 %v3868_v5  ;;  %v3876_v13 = vld [vmem:[%s5184_s1 + $0xd8] sm:$0xff]   ;;  %v3880_v17 = vld [vmem:[%s5184_s1 + $0xe0] sm:$0xff]   ;;  %v3884_v21 = vld [vmem:[%s5184_s1 + $0xe8] sm:$0xff]  }
   0x7   :  { %v3877_v14 = vld [vmem:[%s5184_s1 + $0x18] sm:$0xff]   ;;  %v3881_v18 = vld [vmem:[%s5184_s1 + $0x20] sm:$0xff]   ;;  %v3885_v22 = vld [vmem:[%s5184_s1 + $0x28] sm:$0xff]  }
   0x8   :  { %3331 = vmatpush3.bf16.msra.mxu0 %v3869_v6  ;;  %v3878_v15 = vld [vmem:[%s5184_s1 + $0x98] sm:$0xff]   ;;  %v3882_v19 = vld [vmem:[%s5184_s1 + $0xa0] sm:$0xff]   ;;  %v3886_v23 = vld [vmem:[%s5184_s1 + $0xa8] sm:$0xff]  }
   0x9   :  { %3377 = vmatpush3.bf16.msra.mxu1 %v3870_v7  ;;  %3332 = vmatprep.subr.bf16.mxu0 %v3871_v8  ;;  %v3887_v24 = vld [vmem:[%s5184_s1 + $0x70] sm:$0xff]   ;;  %v3891_v28 = vld [vmem:[%s5184_s1 + $0x78] sm:$0xff]   ;;  %v36_v32 = vld [vmem:[%s5185_s0] sm:$0xff] }
   0xa   :  { %3378 = vmatprep.subr.bf16.mxu1 %v3872_v9  ;;  %v3888_v25 = vld [vmem:[%s5184_s1 + $0xf0] sm:$0xff]   ;;  %v3892_v29 = vld [vmem:[%s5184_s1 + $0xf8] sm:$0xff]   ;;  %v40_v33 = vld [vmem:[%s5185_s0 + $0x20] sm:$0xff] }
   0xb   :  { %v3889_v26 = vld [vmem:[%s5184_s1 + $0x30] sm:$0xff]   ;;  %v3893_v30 = vld [vmem:[%s5184_s1 + $0x38] sm:$0xff]   ;;  %v37_v34 = vld [vmem:[%s5185_s0 + $0x8] sm:$0xff]  ;;  %v4262_v35 = vcombine.low %v36_v32, %v40_v33  ;;  %v4264_v36 = vcombine.high %v36_v32, %v40_v33 }
   0xc   :  { %3333 = vmatpush3.bf16.msra.mxu0 %v3873_v10  ;;  %v3890_v27 = vld [vmem:[%s5184_s1 + $0xb0] sm:$0xff]   ;;  %v3894_v31 = vld [vmem:[%s5184_s1 + $0xb8] sm:$0xff]   ;;  %v41_v37 = vld [vmem:[%s5185_s0 + $0x28] sm:$0xff] }
   0xd   :  { %3379 = vmatpush3.bf16.msra.mxu1 %v3874_v11  ;;  %3334 = vmatprep.subr.bf16.mxu0 %v3875_v12  ;;  %v4269_v38 = vcombine.low %v37_v34, %v41_v37  ;;  %v4271_v39 = vcombine.high %v37_v34, %v41_v37  ;;  %v3895_v40 = vld [vmem:[%s5184_s1 + $0x140] sm:$0xff]   ;;  %v3899_v44 = vld [vmem:[%s5184_s1 + $0x148] sm:$0xff]   ;;  %v3903_v56 = vld [vmem:[%s5184_s1 + $0x150] sm:$0xff]  }
   0xe   :  { %3380 = vmatprep.subr.bf16.mxu1 %v3876_v13  ;;  %804 = vmatprep.mubr.bf16.mxu0 %v4264_v36  ;;  %v3896_v41 = vld [vmem:[%s5184_s1 + $0x100] sm:$0xff]   ;;  %v3900_v45 = vld [vmem:[%s5184_s1 + $0x108] sm:$0xff]   ;;  %v3904_v57 = vld [vmem:[%s5184_s1 + $0x110] sm:$0xff]  }
   0xf   :  { %875 = vmatprep.mubr.bf16.mxu1 %v4271_v39  ;;  %v3897_v42 = vld [vmem:[%s5184_s1 + $0x1c0] sm:$0xff]   ;;  %v45_v49 = vld [vmem:[%s5185_s0 + $0x48] sm:$0xff]  ;;  %v3905_v58 = vld [vmem:[%s5184_s1 + $0x1d0] sm:$0xff]  }
  0x10   :  { %3335 = vmatpush3.bf16.msra.mxu0 %v3877_v14  ;;  %v3898_v43 = vld [vmem:[%s5184_s1 + $0x180] sm:$0xff]   ;;  %v49_v50 = vld [vmem:[%s5185_s0 + $0x68] sm:$0xff]  ;;  %v3906_v59 = vld [vmem:[%s5184_s1 + $0x190] sm:$0xff]  }
  0x11   :  { %3381 = vmatpush3.bf16.msra.mxu1 %v3878_v15  ;;  %3336 = vmatprep.subr.bf16.mxu0 %v3879_v16  ;;  %v44_v46 = vld [vmem:[%s5185_s0 + $0x40] sm:$0xff]  ;;  %v4311_v52 = vcombine.high %v45_v49, %v49_v50  ;;  %v3901_v53 = vld [vmem:[%s5184_s1 + $0x1c8] sm:$0xff]   ;;  %v4316_v54 = vcombine.low %v45_v49, %v49_v50  ;;  %v3907_v2 = vld [vmem:[%s5184_s1 + $0x158] sm:$0xff]  }
  0x12   :  { %3382 = vmatprep.subr.bf16.mxu1 %v3880_v17  ;;  %v48_v47 = vld [vmem:[%s5185_s0 + $0x60] sm:$0xff]  ;;  %v3902_v55 = vld [vmem:[%s5184_s1 + $0x188] sm:$0xff]   ;;  %v3908_v5 = vld [vmem:[%s5184_s1 + $0x118] sm:$0xff]  }
  0x13   :  { %v4301_v48 = vcombine.high %v44_v46, %v48_v47  ;;  %v4309_v51 = vcombine.low %v44_v46, %v48_v47  ;;  %v52_v60 = vld [vmem:[%s5185_s0 + $0x80] sm:$0xff]  ;;  %v53_v62 = vld [vmem:[%s5185_s0 + $0x88] sm:$0xff]  ;;  %v3909_v6 = vld [vmem:[%s5184_s1 + $0x1d8] sm:$0xff]  }
  0x14   :  { %3337 = vmatpush3.bf16.msra.mxu0 %v3881_v18  ;;  %v56_v61 = vld [vmem:[%s5185_s0 + $0xa0] sm:$0xff]  ;;  %v57_v63 = vld [vmem:[%s5185_s0 + $0xa8] sm:$0xff]  ;;  %v3910_v7 = vld [vmem:[%s5184_s1 + $0x198] sm:$0xff]  }
  0x15   :  { %3383 = vmatpush3.bf16.msra.mxu1 %v3882_v19  ;;  %3338 = vmatprep.subr.bf16.mxu0 %v3883_v20  ;;  %v4349_v0 = vcombine.high %v52_v60, %v56_v61  ;;  %v4351_v1 = vcombine.high %v53_v62, %v57_v63  ;;  %v4356_v3 = vcombine.low %v52_v60, %v56_v61  ;;  %v3911_v8 = vld [vmem:[%s5184_s1 + $0x160] sm:$0xff]   ;;  %v61_v13 = vld [vmem:[%s5185_s0 + $0xc8] sm:$0xff]  ;;  %v3926_v33 = vld [vmem:[%s5184_s1 + $0x1b0] sm:$0xff]  }
  0x16   :  { %3384 = vmatprep.subr.bf16.mxu1 %v3884_v21  ;;  %v4358_v4 = vcombine.low %v53_v62, %v57_v63  ;;  %v3912_v9 = vld [vmem:[%s5184_s1 + $0x120] sm:$0xff]   ;;  %v65_v15 = vld [vmem:[%s5185_s0 + $0xe8] sm:$0xff]  ;;  %v3927_v34 = vld [vmem:[%s5184_s1 + $0x178] sm:$0xff]  }
  0x17   :  { %v3913_v10 = vld [vmem:[%s5184_s1 + $0x1e0] sm:$0xff]   ;;  %v4398_v17 = vcombine.high %v61_v13, %v65_v15  ;;  %v4403_v19 = vcombine.low %v61_v13, %v65_v15  ;;  %v3915_v20 = vld [vmem:[%s5184_s1 + $0x168] sm:$0xff]   ;;  %v3928_v37 = vld [vmem:[%s5184_s1 + $0x138] sm:$0xff]  }
  0x18   :  { %3339 = vmatpush3.bf16.msra.mxu0 %v3885_v22  ;;  %v60_v11 = vld [vmem:[%s5185_s0 + $0xc0] sm:$0xff]  ;;  %v3916_v21 = vld [vmem:[%s5184_s1 + $0x128] sm:$0xff]   ;;  %v43_v46 = vld [vmem:[%s5185_s0 + $0x38] sm:$0xff] }
  0x19   :  { %3385 = vmatpush3.bf16.msra.mxu1 %v3886_v23  ;;  %3340 = vmatprep.subr.bf16.mxu0 %v3887_v24  ;;  %v64_v12 = vld [vmem:[%s5185_s0 + $0xe0] sm:$0xff]  ;;  %v3917_v22 = vld [vmem:[%s5184_s1 + $0x1e8] sm:$0xff]   ;;  %v3919_v24 = vld [vmem:[%s5184_s1 + $0x170] sm:$0xff]  }
  0x1a   :  { %3386 = vmatprep.subr.bf16.mxu1 %v3888_v25  ;;  %v4391_v14 = vcombine.high %v60_v11, %v64_v12  ;;  %v4396_v16 = vcombine.low %v60_v11, %v64_v12  ;;  %v3914_v18 = vld [vmem:[%s5184_s1 + $0x1a0] sm:$0xff]   ;;  %v3918_v23 = vld [vmem:[%s5184_s1 + $0x1a8] sm:$0xff]   ;;  %v46_v60 = vld [vmem:[%s5185_s0 + $0x50] sm:$0xff] }
  0x1b   :  { %v68_v25 = vld [vmem:[%s5185_s0 + $0x100] sm:$0xff]  ;;  %v50_v61 = vld [vmem:[%s5185_s0 + $0x70] sm:$0xff]  ;;  %v47_v63 = vld [vmem:[%s5185_s0 + $0x58] sm:$0xff] }
  0x1c   :  { %3341 = vmatpush3.bf16.msra.mxu0 %v3889_v26  ;;  %v69_v26 = vld [vmem:[%s5185_s0 + $0x108] sm:$0xff]  ;;  %v3931_v50 = vld [vmem:[%s5186_s2 + $0x40] sm:$0xff]   ;;  %v4511_v62 = vcombine.high %v46_v60, %v50_v61  ;;  %v3940_v11 = vld [vmem:[%s5186_s2 + $0x10] sm:$0xff]  }
  0x1d   :  { %3387 = vmatpush3.bf16.msra.mxu1 %v3890_v27  ;;  %3342 = vmatprep.subr.bf16.mxu0 %v3891_v28  ;;  %v4430_v27 = vcombine.high %v68_v25, %v68_v25  ;;  %v4432_v28 = vcombine.high %v69_v26, %v69_v26  ;;  %v4444_v32 = vcombine.low %v69_v26, %v69_v26  ;;  %v3941_v12 = vld [vmem:[%s5186_s2 + $0xd0] sm:$0xff]  }
  0x1e   :  { %3388 = vmatprep.subr.bf16.mxu1 %v3892_v29  ;;  %v3922_v29 = vld [vmem:[%s5184_s1 + $0x130] sm:$0xff]  }
  0x1f   :  { %v3942_v13 = vld [vmem:[%s5186_s2 + $0x90] sm:$0xff]  }
  0x20   :  { %3343 = vmatpush3.bf16.msra.mxu0 %v3893_v30  ;;  %v4437_v30 = vcombine.low %v68_v25, %v68_v25  ;;  %v54_v15 = vld [vmem:[%s5185_s0 + $0x90] sm:$0xff]  ;;  %v3944_v25 = vld [vmem:[%s5186_s2 + $0x18] sm:$0xff]  }
  0x21   :  { %3389 = vmatpush3.bf16.msra.mxu1 %v3894_v31  ;;  %3420 = vmatprep.subr.bf16.mxu0 %v3895_v40  ;;  %v3925_v31 = vld [vmem:[%s5184_s1 + $0x1f0] sm:$0xff]   ;;  %v3929_v40 = vld [vmem:[%s5184_s1 + $0x1f8] sm:$0xff]  }
  0x22   :  { %3466 = vmatprep.subr.bf16.mxu1 %v3897_v42  ;;  %v38_v42 = vld [vmem:[%s5185_s0 + $0x10] sm:$0xff] }
  0x23   :  { %805 = vmatmul.mubr.bf16.vlgmr.msra.gmra.mrb[0].mxu0 %v4262_v35 }
  0x24   :  { %876 = vmatmul.mubr.bf16.vlgmr.msra.gmra.mrb[0].mxu1 %v4269_v38  ;;  %3421 = vmatpush3.bf16.msra.mxu0 %v3896_v41  ;;  %v3930_v41 = vld [vmem:[%s5184_s1 + $0x1b8] sm:$0xff]  }
  0x25   :  { %3467 = vmatpush3.bf16.msra.mxu1 %v3898_v43  ;;  %3422 = vmatprep.subr.bf16.mxu0 %v3899_v44  ;;  %v42_v43 = vld [vmem:[%s5185_s0 + $0x30] sm:$0xff]  ;;  %v39_v44 = vld [vmem:[%s5185_s0 + $0x18] sm:$0xff] }
  0x26   :  { %812 = vmatprep.mubr.bf16.mxu0 %v4301_v48  ;;  %883 = vmatprep.mubr.bf16.mxu1 %v4311_v52  ;;  %v4477_v47 = vcombine.low %v38_v42, %v42_v43  ;;  %v4479_v49 = vcombine.high %v39_v44, %v43_v46 }
  0x27   :  { %3468 = vmatprep.subr.bf16.mxu1 %v3901_v53  ;;  %v4485_v53 = vcombine.low %v39_v44, %v43_v46  ;;  %v67_v46 = vld [vmem:[%s5185_s0 + $0xf8] sm:$0xff] }
  0x28   :  { %3423 = vmatpush3.bf16.msra.mxu0 %v3900_v45  ;;  %v4472_v45 = vcombine.high %v38_v42, %v42_v43  ;;  %v66_v42 = vld [vmem:[%s5185_s0 + $0xf0] sm:$0xff]  ;;  %v63_v43 = vld [vmem:[%s5185_s0 + $0xd8] sm:$0xff] }
  0x29   :  { %3469 = vmatpush3.bf16.msra.mxu1 %v3902_v55  ;;  %3424 = vmatprep.subr.bf16.mxu0 %v3903_v56  ;;  %v3932_v55 = vld [vmem:[%s5186_s2] sm:$0xff]  }
  0x2a   :  { %3470 = vmatprep.subr.bf16.mxu1 %v3905_v58  ;;  %v3933_v56 = vld [vmem:[%s5186_s2 + $0xc0] sm:$0xff]   ;;  %v3935_v58 = vld [vmem:[%s5186_s2 + $0x48] sm:$0xff]  }
  0x2b   :  { %813 = vmatmul.mubr.bf16.gmra.mrb[4].mxu0 %v4309_v51 }
  0x2c   :  { %884 = vmatmul.mubr.bf16.gmra.mrb[4].mxu1 %v4316_v54  ;;  %3425 = vmatpush3.bf16.msra.mxu0 %v3904_v57  ;;  %v3934_v57 = vld [vmem:[%s5186_s2 + $0x80] sm:$0xff]  }
  0x2d   :  { %3471 = vmatpush3.bf16.msra.mxu1 %v3906_v59  ;;  %820 = vmatprep.mubr.bf16.mxu0 %v4349_v0  ;;  %v3936_v59 = vld [vmem:[%s5186_s2 + $0x8] sm:$0xff]  }
  0x2e   :  { %891 = vmatprep.mubr.bf16.mxu1 %v4351_v1  ;;  %3426 = vmatprep.subr.bf16.mxu0 %v3907_v2  ;;  %v51_v2 = vld [vmem:[%s5185_s0 + $0x78] sm:$0xff] }
  0x2f   :  { %3472 = vmatprep.subr.bf16.mxu1 %v3909_v6  ;;  %v3937_v6 = vld [vmem:[%s5186_s2 + $0xc8] sm:$0xff]  }
  0x30   :  { %3427 = vmatpush3.bf16.msra.mxu0 %v3908_v5  ;;  %v4519_v5 = vcombine.high %v47_v63, %v51_v2 }
  0x31   :  { %3473 = vmatpush3.bf16.msra.mxu1 %v3910_v7  ;;  %3428 = vmatprep.subr.bf16.mxu0 %v3911_v8  ;;  %v4525_v7 = vcombine.low %v46_v60, %v50_v61  ;;  %v3938_v8 = vld [vmem:[%s5186_s2 + $0x88] sm:$0xff]  }
  0x32   :  { %3474 = vmatprep.subr.bf16.mxu1 %v3913_v10  ;;  %v3939_v10 = vld [vmem:[%s5186_s2 + $0x50] sm:$0xff]   ;;  %v3953_v60 = vld [vmem:[%s5186_s2 + $0xe8] sm:$0xff]  }
  0x33   :  { %821 = vmatmul.mubr.bf16.gmra.mrb[8].mxu0 %v4356_v3  ;;  %v3954_v61 = vld [vmem:[%s5186_s2 + $0xa8] sm:$0xff]  }
  0x34   :  { %892 = vmatmul.mubr.bf16.gmra.mrb[8].mxu1 %v4358_v4  ;;  %3429 = vmatpush3.bf16.msra.mxu0 %v3912_v9  ;;  %v4531_v9 = vcombine.low %v47_v63, %v51_v2  ;;  %v3955_v63 = vld [vmem:[%s5186_s2 + $0x70] sm:$0xff]  }
  0x35   :  { %828 = vmatprep.mubr.bf16.mxu0 %v4391_v14  ;;  %899 = vmatprep.mubr.bf16.mxu1 %v4398_v17  ;;  %v70_v2 = vld [vmem:[%s5185_s0 + $0x110] sm:$0xff] }
  0x36   :  { %3475 = vmatpush3.bf16.msra.mxu1 %v3914_v18  ;;  %3430 = vmatprep.subr.bf16.mxu0 %v3915_v20  ;;  %v58_v18 = vld [vmem:[%s5185_s0 + $0xb0] sm:$0xff]  ;;  %v55_v20 = vld [vmem:[%s5185_s0 + $0x98] sm:$0xff] }
  0x37   :  { %3476 = vmatprep.subr.bf16.mxu1 %v3917_v22  ;;  %v4559_v22 = vcombine.high %v54_v15, %v58_v18  ;;  %v4571_v26 = vcombine.low %v54_v15, %v58_v18  ;;  %v4655_v15 = vcombine.low %v70_v2, %v70_v2  ;;  %v3963_v18 = vld [vmem:[%s5186_s2 + $0x78] sm:$0xff]  }
  0x38   :  { %3431 = vmatpush3.bf16.msra.mxu0 %v3916_v21  ;;  %v59_v21 = vld [vmem:[%s5185_s0 + $0xb8] sm:$0xff] }
  0x39   :  { %3432 = vmatprep.subr.bf16.mxu0 %v3919_v24  ;;  %v3943_v24 = vld [vmem:[%s5186_s2 + $0x58] sm:$0xff]  }
  0x3a   :  { %3477 = vmatpush3.bf16.msra.mxu1 %v3918_v23  ;;  %v4561_v23 = vcombine.high %v55_v20, %v59_v21 }
  0x3b   :  { %829 = vmatmul.mubr.bf16.gmra.mrb[12].mxu0 %v4396_v16  ;;  %3478 = vmatprep.subr.bf16.mxu1 %v3925_v31  ;;  %v4576_v31 = vcombine.low %v55_v20, %v59_v21  ;;  %v3964_v21 = vld [vmem:[%s5186_s2 + $0x38] sm:$0xff]  }
  0x3c   :  { %900 = vmatmul.mubr.bf16.gmra.mrb[12].mxu1 %v4403_v19  ;;  %836 = vmatprep.mubr.bf16.mxu0 %v4430_v27 }
  0x3d   :  { %907 = vmatprep.mubr.bf16.mxu1 %v4432_v28  ;;  %3433 = vmatpush3.bf16.msra.mxu0 %v3922_v29  ;;  %v3945_v29 = vld [vmem:[%s5186_s2 + $0xd8] sm:$0xff]  }
  0x3e   :  { %3479 = vmatpush3.bf16.msra.mxu1 %v3926_v33  ;;  %3434 = vmatprep.subr.bf16.mxu0 %v3927_v34  ;;  %v3946_v33 = vld [vmem:[%s5186_s2 + $0x98] sm:$0xff]   ;;  %v3947_v34 = vld [vmem:[%s5186_s2 + $0x60] sm:$0xff]  }
  0x3f   :  { %3480 = vmatprep.subr.bf16.mxu1 %v3929_v40  ;;  %v3949_v40 = vld [vmem:[%s5186_s2 + $0xe0] sm:$0xff]  }
  0x41   :  { %3435 = vmatpush3.bf16.msra.mxu0 %v3928_v37  ;;  %v3948_v37 = vld [vmem:[%s5186_s2 + $0x20] sm:$0xff]  }
  0x42   :  { %3481 = vmatpush3.bf16.msra.mxu1 %v3930_v41  ;;  %3512 = vmatprep.subr.bf16.mxu0 %v3931_v50  ;;  %v62_v41 = vld [vmem:[%s5185_s0 + $0xd0] sm:$0xff]  ;;  %v4606_v50 = vcombine.high %v63_v43, %v67_v46 }
  0x43   :  { %837 = vmatmul.mubr.bf16.gmra.mrb[16].mxu0 %v4437_v30  ;;  %3558 = vmatprep.subr.bf16.mxu1 %v3933_v56  ;;  %v4601_v44 = vcombine.high %v62_v41, %v66_v42  ;;  %v4612_v56 = vcombine.low %v62_v41, %v66_v42  ;;  %v3974_v41 = vld [vmem:[%s5186_s2 + $0x188] sm:$0xff]   ;;  %v3975_v42 = vld [vmem:[%s5186_s2 + $0x150] sm:$0xff]  }
  0x44   :  { %908 = vmatmul.mubr.bf16.gmra.mrb[16].mxu1 %v4444_v32  ;;  %946 = vmatprep.mubr.bf16.mxu0 %v4472_v45 }
  0x45   :  { %1017 = vmatprep.mubr.bf16.mxu1 %v4479_v49 }
  0x4b   :  { %947 = vmatmul.mubr.bf16.vlgmr.msra.gmra.mrb[20].mxu0 %v4477_v47 }
  0x4c   :  { %1018 = vmatmul.mubr.bf16.vlgmr.msra.gmra.mrb[20].mxu1 %v4485_v53  ;;  %3513 = vmatpush3.bf16.msra.mxu0 %v3932_v55  ;;  %v3950_v55 = vld [vmem:[%s5186_s2 + $0xa0] sm:$0xff]  }
  0x4d   :  { %3559 = vmatpush3.bf16.msra.mxu1 %v3934_v57  ;;  %3514 = vmatprep.subr.bf16.mxu0 %v3935_v58  ;;  %v3951_v57 = vld [vmem:[%s5186_s2 + $0x68] sm:$0xff]   ;;  %v4618_v58 = vcombine.low %v63_v43, %v67_v46  ;;  %v3978_v43 = vld [vmem:[%s5186_s2 + $0x190] sm:$0xff]   ;;  %v3981_v46 = vld [vmem:[%s5186_s2 + $0x1d8] sm:$0xff]  }
  0x4e   :  { %954 = vmatprep.mubr.bf16.mxu0 %v4511_v62  ;;  %1025 = vmatprep.mubr.bf16.mxu1 %v4519_v5 }
  0x4f   :  { %3560 = vmatprep.subr.bf16.mxu1 %v3937_v6  ;;  %v71_v6 = vld [vmem:[%s5185_s0 + $0x118] sm:$0xff] }
  0x50   :  { %3515 = vmatpush3.bf16.msra.mxu0 %v3936_v59  ;;  %v3952_v59 = vld [vmem:[%s5186_s2 + $0x28] sm:$0xff]   ;;  %v4660_v20 = vcombine.low %v71_v6, %v71_v6 }
  0x51   :  { %3561 = vmatpush3.bf16.msra.mxu1 %v3938_v8  ;;  %3516 = vmatprep.subr.bf16.mxu0 %v3939_v10  ;;  %v4640_v8 = vcombine.high %v70_v2, %v70_v2  ;;  %v4642_v10 = vcombine.high %v71_v6, %v71_v6  ;;  %v3997_v2 = vld [vmem:[%s5186_s2 + $0x1f8] sm:$0xff]  }
  0x52   :  { %3562 = vmatprep.subr.bf16.mxu1 %v3941_v12  ;;  %v3961_v12 = vld [vmem:[%s5186_s2 + $0xf0] sm:$0xff]   ;;  %v3996_v6 = vld [vmem:[%s5186_s2 + $0x138] sm:$0xff]  }
  0x53   :  { %955 = vmatmul.mubr.bf16.gmra.mrb[24].mxu0 %v4525_v7 }
  0x54   :  { %1026 = vmatmul.mubr.bf16.gmra.mrb[24].mxu1 %v4531_v9  ;;  %3517 = vmatpush3.bf16.msra.mxu0 %v3940_v11  ;;  %v3958_v11 = vld [vmem:[%s5186_s2 + $0x30] sm:$0xff]  }
  0x55   :  { %3563 = vmatpush3.bf16.msra.mxu1 %v3942_v13  ;;  %962 = vmatprep.mubr.bf16.mxu0 %v4559_v22  ;;  %v3962_v13 = vld [vmem:[%s5186_s2 + $0xb0] sm:$0xff]  }
  0x56   :  { %1033 = vmatprep.mubr.bf16.mxu1 %v4561_v23  ;;  %3518 = vmatprep.subr.bf16.mxu0 %v3943_v24  ;;  %v3965_v24 = vld [vmem:[%s5186_s2 + $0xf8] sm:$0xff]  }
  0x57   :  { %3564 = vmatprep.subr.bf16.mxu1 %v3945_v29  ;;  %v3967_v29 = vld [vmem:[%s5186_s2 + $0x140] sm:$0xff]  }
  0x58   :  { %3519 = vmatpush3.bf16.msra.mxu0 %v3944_v25  ;;  %v3966_v25 = vld [vmem:[%s5186_s2 + $0xb8] sm:$0xff]  }
  0x59   :  { %3565 = vmatpush3.bf16.msra.mxu1 %v3946_v33  ;;  %3520 = vmatprep.subr.bf16.mxu0 %v3947_v34  ;;  %v3969_v33 = vld [vmem:[%s5186_s2 + $0x1c0] sm:$0xff]  }
  0x5a   :  { %3566 = vmatprep.subr.bf16.mxu1 %v3949_v40  ;;  %v3968_v34 = vld [vmem:[%s5186_s2 + $0x100] sm:$0xff]   ;;  %v3972_v40 = vld [vmem:[%s5186_s2 + $0x108] sm:$0xff]  }
  0x5b   :  { %963 = vmatmul.mubr.bf16.gmra.mrb[28].mxu0 %v4571_v26 }
  0x5c   :  { %1034 = vmatmul.mubr.bf16.gmra.mrb[28].mxu1 %v4576_v31  ;;  %3521 = vmatpush3.bf16.msra.mxu0 %v3948_v37  ;;  %v3970_v37 = vld [vmem:[%s5186_s2 + $0x180] sm:$0xff]  }
  0x5d   :  { %970 = vmatprep.mubr.bf16.mxu0 %v4601_v44  ;;  %1041 = vmatprep.mubr.bf16.mxu1 %v4606_v50 }
  0x5e   :  { %3567 = vmatpush3.bf16.msra.mxu1 %v3950_v55  ;;  %3522 = vmatprep.subr.bf16.mxu0 %v3951_v57  ;;  %v3982_v55 = vld [vmem:[%s5186_s2 + $0x198] sm:$0xff]   ;;  %v3983_v57 = vld [vmem:[%s5186_s2 + $0x160] sm:$0xff]  }
  0x5f   :  { %3568 = vmatprep.subr.bf16.mxu1 %v3953_v60  ;;  %v3988_v60 = vld [vmem:[%s5186_s2 + $0x128] sm:$0xff]  }
  0x60   :  { %3523 = vmatpush3.bf16.msra.mxu0 %v3952_v59  ;;  %v3989_v59 = vld [vmem:[%s5186_s2 + $0x1e8] sm:$0xff]  }
  0x61   :  { %3524 = vmatprep.subr.bf16.mxu0 %v3955_v63  ;;  %v3995_v63 = vld [vmem:[%s5186_s2 + $0x178] sm:$0xff]  }
  0x62   :  { %3569 = vmatpush3.bf16.msra.mxu1 %v3954_v61  ;;  %v3991_v61 = vld [vmem:[%s5186_s2 + $0x170] sm:$0xff]  }
  0x63   :  { %971 = vmatmul.mubr.bf16.gmra.mrb[32].mxu0 %v4612_v56  ;;  %3570 = vmatprep.subr.bf16.mxu1 %v3961_v12 }
  0x64   :  { %1042 = vmatmul.mubr.bf16.gmra.mrb[32].mxu1 %v4618_v58  ;;  %978 = vmatprep.mubr.bf16.mxu0 %v4640_v8 }
  0x65   :  { %1049 = vmatprep.mubr.bf16.mxu1 %v4642_v10  ;;  %3525 = vmatpush3.bf16.msra.mxu0 %v3958_v11 }
  0x66   :  { %3571 = vmatpush3.bf16.msra.mxu1 %v3962_v13  ;;  %3526 = vmatprep.subr.bf16.mxu0 %v3963_v18 }
  0x67   :  { %3572 = vmatprep.subr.bf16.mxu1 %v3965_v24  ;;  %v4009_v24 = vld [vmem:[%s5187_s4 + $0x28] sm:$0xff]  }
  0x69   :  { %3527 = vmatpush3.bf16.msra.mxu0 %v3964_v21 }
  0x6a   :  { %3573 = vmatpush3.bf16.msra.mxu1 %v3966_v25  ;;  %3604 = vmatprep.subr.bf16.mxu0 %v3967_v29  ;;  %v4010_v25 = vld [vmem:[%s5187_s4 + $0x68] sm:$0xff]  }
  0x6b   :  { %979 = vmatmul.mubr.bf16.gmra.mrb[36].mxu0 %v4655_v15  ;;  %3650 = vmatprep.subr.bf16.mxu1 %v3969_v33 }
  0x6c   :  { %1050 = vmatmul.mubr.bf16.gmra.mrb[36].mxu1 %v4660_v20  ;;  %1600 = vmatprep.mubr.bf16.mxu0 %v4264_v36  ;;  %v3971_v36 = vld [vmem:[%s5186_s2 + $0x148] sm:$0xff]  }
  0x6d   :  { %1671 = vmatprep.mubr.bf16.mxu1 %v4271_v39  ;;  %v3973_v39 = vld [vmem:[%s5186_s2 + $0x1c8] sm:$0xff]  }
  0x73   :  { %1601 = vmatmul.mubr.bf16.vlgmr.msra.gmra.mrb[40].mxu0 %v4262_v35  ;;  %v3977_v35 = vld [vmem:[%s5186_s2 + $0x1d0] sm:$0xff]  }
  0x74   :  { %1672 = vmatmul.mubr.bf16.vlgmr.msra.gmra.mrb[40].mxu1 %v4269_v38  ;;  %3605 = vmatpush3.bf16.msra.mxu0 %v3968_v34  ;;  %v3976_v38 = vld [vmem:[%s5186_s2 + $0x110] sm:$0xff]  }
  0x75   :  { %3651 = vmatpush3.bf16.msra.mxu1 %v3970_v37  ;;  %3606 = vmatprep.subr.bf16.mxu0 %v3971_v36 }
  0x76   :  { %1607 = vmatprep.mubr.bf16.mxu0 %v4301_v48  ;;  %1678 = vmatprep.mubr.bf16.mxu1 %v4311_v52  ;;  %v3979_v48 = vld [vmem:[%s5186_s2 + $0x158] sm:$0xff]  }
  0x77   :  { %3652 = vmatprep.subr.bf16.mxu1 %v3973_v39  ;;  %v3980_v52 = vld [vmem:[%s5186_s2 + $0x118] sm:$0xff]  }
  0x78   :  { %3607 = vmatpush3.bf16.msra.mxu0 %v3972_v40 }
  0x79   :  { %3653 = vmatpush3.bf16.msra.mxu1 %v3974_v41  ;;  %3608 = vmatprep.subr.bf16.mxu0 %v3975_v42  ;;  %v4011_v41 = vld [vmem:[%s5187_s4 + $0x30] sm:$0xff]  }
  0x7a   :  { %3654 = vmatprep.subr.bf16.mxu1 %v3977_v35  ;;  %v4012_v42 = vld [vmem:[%s5187_s4 + $0x70] sm:$0xff]  }
  0x7b   :  { %1608 = vmatmul.mubr.bf16.gmra.mrb[44].mxu0 %v4309_v51  ;;  %v3985_v51 = vld [vmem:[%s5186_s2 + $0x1e0] sm:$0xff]  }
  0x7c   :  { %1679 = vmatmul.mubr.bf16.gmra.mrb[44].mxu1 %v4316_v54  ;;  %3609 = vmatpush3.bf16.msra.mxu0 %v3976_v38  ;;  %v3984_v54 = vld [vmem:[%s5186_s2 + $0x120] sm:$0xff]  }
  0x7d   :  { %3655 = vmatpush3.bf16.msra.mxu1 %v3978_v43  ;;  %1615 = vmatprep.mubr.bf16.mxu0 %v4349_v0  ;;  %v3986_v0 = vld [vmem:[%s5186_s2 + $0x1a0] sm:$0xff]  }
  0x7e   :  { %1686 = vmatprep.mubr.bf16.mxu1 %v4351_v1  ;;  %3610 = vmatprep.subr.bf16.mxu0 %v3979_v48  ;;  %v3987_v1 = vld [vmem:[%s5186_s2 + $0x168] sm:$0xff]  }
  0x7f   :  { %3656 = vmatprep.subr.bf16.mxu1 %v3981_v46 }
  0x80   :  { %3611 = vmatpush3.bf16.msra.mxu0 %v3980_v52 }
  0x81   :  { %3657 = vmatpush3.bf16.msra.mxu1 %v3982_v55  ;;  %3612 = vmatprep.subr.bf16.mxu0 %v3983_v57  ;;  %v4013_v57 = vld [vmem:[%s5187_s4 + $0x38] sm:$0xff]  }
  0x82   :  { %3658 = vmatprep.subr.bf16.mxu1 %v3985_v51  ;;  %v4014_v51 = vld [vmem:[%s5187_s4 + $0x78] sm:$0xff]  }
  0x83   :  { %1616 = vmatmul.mubr.bf16.gmra.mrb[48].mxu0 %v4356_v3  ;;  %v3990_v3 = vld [vmem:[%s5186_s2 + $0x1a8] sm:$0xff]  }
  0x84   :  { %1687 = vmatmul.mubr.bf16.gmra.mrb[48].mxu1 %v4358_v4  ;;  %3613 = vmatpush3.bf16.msra.mxu0 %v3984_v54  ;;  %v3993_v4 = vld [vmem:[%s5186_s2 + $0x1f0] sm:$0xff]  }
  0x85   :  { %1623 = vmatprep.mubr.bf16.mxu0 %v4391_v14  ;;  %1694 = vmatprep.mubr.bf16.mxu1 %v4398_v17  ;;  %v3992_v14 = vld [vmem:[%s5186_s2 + $0x130] sm:$0xff]  }
  0x86   :  { %3659 = vmatpush3.bf16.msra.mxu1 %v3986_v0  ;;  %3614 = vmatprep.subr.bf16.mxu0 %v3987_v1  ;;  %v3994_v17 = vld [vmem:[%s5186_s2 + $0x1b0] sm:$0xff]  }
  0x87   :  { %3660 = vmatprep.subr.bf16.mxu1 %v3989_v59 }
  0x88   :  { %3615 = vmatpush3.bf16.msra.mxu0 %v3988_v60 }
  0x89   :  { %3616 = vmatprep.subr.bf16.mxu0 %v3991_v61 }
  0x8a   :  { %3661 = vmatpush3.bf16.msra.mxu1 %v3990_v3 }
  0x8b   :  { %1624 = vmatmul.mubr.bf16.gmra.mrb[52].mxu0 %v4396_v16  ;;  %3662 = vmatprep.subr.bf16.mxu1 %v3993_v4  ;;  %v3998_v16 = vld [vmem:[%s5186_s2 + $0x1b8] sm:$0xff]   ;;  %v4870_v4 = vld [vmem:[%s5187_s4 + $0x80] sm:$0xff]  }
  0x8c   :  { %1695 = vmatmul.mubr.bf16.gmra.mrb[52].mxu1 %v4403_v19  ;;  %1631 = vmatprep.mubr.bf16.mxu0 %v4430_v27  ;;  %v3999_v19 = vld [vmem:[%s5187_s4] sm:$0xff]  }
  0x8d   :  { %1702 = vmatprep.mubr.bf16.mxu1 %v4432_v28  ;;  %3617 = vmatpush3.bf16.msra.mxu0 %v3992_v14  ;;  %v4000_v27 = vld [vmem:[%s5187_s4 + $0x40] sm:$0xff]   ;;  %v4001_v28 = vld [vmem:[%s5187_s4 + $0x8] sm:$0xff]  }
  0x8e   :  { %3663 = vmatpush3.bf16.msra.mxu1 %v3994_v17  ;;  %3618 = vmatprep.subr.bf16.mxu0 %v3995_v63  ;;  %v4875_v14 = vld [vmem:[%s5187_s4 + $0xc0] sm:$0xff]  }
  0x8f   :  { %3664 = vmatprep.subr.bf16.mxu1 %v3997_v2 }
  0x91   :  { %3619 = vmatpush3.bf16.msra.mxu0 %v3996_v6 }
  0x92   :  { %3665 = vmatpush3.bf16.msra.mxu1 %v3998_v16  ;;  %3766 = vmatprep.subr.bf16.mxu0 %v3999_v19 }
  0x93   :  { %1632 = vmatmul.mubr.bf16.gmra.mrb[56].mxu0 %v4437_v30  ;;  %3790 = vmatprep.subr.bf16.mxu1 %v4000_v27  ;;  %v4002_v30 = vld [vmem:[%s5187_s4 + $0x48] sm:$0xff]  }
  0x94   :  { %1703 = vmatmul.mubr.bf16.gmra.mrb[56].mxu1 %v4444_v32  ;;  %1742 = vmatprep.mubr.bf16.mxu0 %v4472_v45  ;;  %v4003_v32 = vld [vmem:[%s5187_s4 + $0x10] sm:$0xff]  }
  0x95   :  { %1813 = vmatprep.mubr.bf16.mxu1 %v4479_v49  ;;  %v4004_v45 = vld [vmem:[%s5187_s4 + $0x50] sm:$0xff]  }
  0x9b   :  { %1743 = vmatmul.mubr.bf16.vlgmr.msra.gmra.mrb[60].mxu0 %v4477_v47 }
  0x9c   :  { %1814 = vmatmul.mubr.bf16.vlgmr.msra.gmra.mrb[60].mxu1 %v4485_v53  ;;  %1749 = vmatprep.mubr.bf16.mxu0 %v4511_v62 }
  0x9d   :  { %1820 = vmatprep.mubr.bf16.mxu1 %v4519_v5  ;;  %3767 = vmatpush3.bf16.msra.mxu0 %v3999_v19 }
  0x9e   :  { %3791 = vmatpush3.bf16.msra.mxu1 %v4000_v27  ;;  %3768 = vmatprep.subr.bf16.mxu0 %v4001_v28 }
  0x9f   :  { %3792 = vmatprep.subr.bf16.mxu1 %v4002_v30 }
  0xa1   :  { %3769 = vmatpush3.bf16.msra.mxu0 %v4001_v28 }
  0xa2   :  { %3793 = vmatpush3.bf16.msra.mxu1 %v4002_v30  ;;  %3770 = vmatprep.subr.bf16.mxu0 %v4003_v32 }
  0xa3   :  { %1750 = vmatmul.mubr.bf16.gmra.mrb[64].mxu0 %v4525_v7  ;;  %3794 = vmatprep.subr.bf16.mxu1 %v4004_v45 }
  0xa4   :  { %1821 = vmatmul.mubr.bf16.gmra.mrb[64].mxu1 %v4531_v9  ;;  %1757 = vmatprep.mubr.bf16.mxu0 %v4559_v22  ;;  %v4005_v9 = vld [vmem:[%s5187_s4 + $0x18] sm:$0xff]  }
  0xa5   :  { %1828 = vmatprep.mubr.bf16.mxu1 %v4561_v23  ;;  %3771 = vmatpush3.bf16.msra.mxu0 %v4003_v32  ;;  %v4006_v22 = vld [vmem:[%s5187_s4 + $0x58] sm:$0xff]  }
  0xa6   :  { %3795 = vmatpush3.bf16.msra.mxu1 %v4004_v45  ;;  %3772 = vmatprep.subr.bf16.mxu0 %v4005_v9 }
  0xa7   :  { %3796 = vmatprep.subr.bf16.mxu1 %v4006_v22 }
  0xa9   :  { %3773 = vmatpush3.bf16.msra.mxu0 %v4005_v9 }
  0xaa   :  { %3797 = vmatpush3.bf16.msra.mxu1 %v4006_v22 }
  0xab   :  { %1758 = vmatmul.mubr.bf16.gmra.mrb[68].mxu0 %v4571_v26 }
  0xac   :  { %1829 = vmatmul.mubr.bf16.gmra.mrb[68].mxu1 %v4576_v31  ;;  %1765 = vmatprep.mubr.bf16.mxu0 %v4601_v44 }
  0xad   :  { %1836 = vmatprep.mubr.bf16.mxu1 %v4606_v50 }
  0xb3   :  { %1766 = vmatmul.mubr.bf16.gmra.mrb[72].mxu0 %v4612_v56 }
  0xb4   :  { %1837 = vmatmul.mubr.bf16.gmra.mrb[72].mxu1 %v4618_v58  ;;  %1773 = vmatprep.mubr.bf16.mxu0 %v4640_v8  ;;  %v4007_v8 = vld [vmem:[%s5187_s4 + $0x20] sm:$0xff]  }
  0xb5   :  { %1844 = vmatprep.mubr.bf16.mxu1 %v4642_v10  ;;  %v4008_v10 = vld [vmem:[%s5187_s4 + $0x60] sm:$0xff]   ;;  %3774 = vmatprep.subr.bf16.mxu0 %v4007_v8 }
  0xb6   :  { %3798 = vmatprep.subr.bf16.mxu1 %v4008_v10  ;;  %3775 = vmatpush3.bf16.msra.mxu0 %v4007_v8 }
  0xb7   :  { %3799 = vmatpush3.bf16.msra.mxu1 %v4008_v10  ;;  %3776 = vmatprep.subr.bf16.mxu0 %v4009_v24 }
  0xb8   :  { %3800 = vmatprep.subr.bf16.mxu1 %v4010_v25 }
  0xba   :  { %3777 = vmatpush3.bf16.msra.mxu0 %v4009_v24 }
  0xbb   :  { %1774 = vmatmul.mubr.bf16.gmra.mrb[76].mxu0 %v4655_v15  ;;  %3801 = vmatpush3.bf16.msra.mxu1 %v4010_v25 }
  0xbc   :  { %1845 = vmatmul.mubr.bf16.gmra.mrb[76].mxu1 %v4660_v20  ;;  %3778 = vmatprep.subr.bf16.mxu0 %v4011_v41 }
  0xbd   :  { %3802 = vmatprep.subr.bf16.mxu1 %v4012_v42 }
  0xbe   :  { %3779 = vmatpush3.bf16.msra.mxu0 %v4011_v41 }
  0xbf   :  { %3803 = vmatpush3.bf16.msra.mxu1 %v4012_v42  ;;  %3780 = vmatprep.subr.bf16.mxu0 %v4013_v57 }
  0xc0   :  { %3804 = vmatprep.subr.bf16.mxu1 %v4014_v51 }
  0xc2   :  { %3781 = vmatpush3.bf16.msra.mxu0 %v4013_v57 }
  0xc3   :  { %3805 = vmatpush3.bf16.msra.mxu1 %v4014_v51  ;;  %3814 = vmatprep.subr.bf16.mxu0 %v4870_v4 }
  0xc4   :  { %3838 = vmatprep.subr.bf16.mxu1 %v4875_v14 }
  0xf6   :  { %v3344_v47 = vpop.f32.mrb[0].mxu0 }
  0xf7   :  { %v3390_v49 = vpop.f32.mrb[0].mxu1  ;;  %v3345_v53 = vpop.f32.mrb[1].mxu0 }
  0xf8   :  { %v3346_v62 = vadd.f32 %v3345_v53, %v3344_v47  ;;  %v3391_v5 = vpop.f32.mrb[1].mxu1  ;;  %v3347_v7 = vpop.f32.mrb[2].mxu0 }
  0xf9   :  { %v3392_v23 = vadd.f32 %v3391_v5, %v3390_v49  ;;  %v3393_v26 = vpop.f32.mrb[2].mxu1  ;;  %v3348_v31 = vpop.f32.mrb[3].mxu0 }
  0xfa   :  { %v3349_v44 = vadd.f32 %v3348_v31, %v3347_v7  ;;  %v3394_v50 = vpop.f32.mrb[3].mxu1 }
  0xfb   :  { %v4833_v56 = vadd.f32 %v3392_v23, %v3346_v62  ;;  %v3395_v58 = vadd.f32 %v3394_v50, %v3393_v26 }
  0xfd   :  { %v4841_v11 = vadd.f32 %v3395_v58, %v3349_v44 }
  0xfe   :  { %v3350_v12 = vpop.f32.mrb[4].mxu0 }
  0xff   :  { %v3396_v13 = vpop.f32.mrb[4].mxu1  ;;  %v3351_v15 = vpop.f32.mrb[5].mxu0 }
 0x100   :  { %v3352_v18 = vadd.f32 %v3351_v15, %v3350_v12  ;;  %v3397_v20 = vpop.f32.mrb[5].mxu1  ;;  %v3353_v21 = vpop.f32.mrb[6].mxu0 }
 0x101   :  { %v3398_v29 = vadd.f32 %v3397_v20, %v3396_v13  ;;  %v3399_v33 = vpop.f32.mrb[6].mxu1  ;;  %v3354_v34 = vpop.f32.mrb[7].mxu0 }
 0x102   :  { %v3355_v37 = vadd.f32 %v3354_v34, %v3353_v21  ;;  %v3400_v36 = vpop.f32.mrb[7].mxu1 }
 0x103   :  { %v4849_v40 = vadd.f32 %v3398_v29, %v3352_v18  ;;  %v3401_v39 = vadd.f32 %v3400_v36, %v3399_v33 }
 0x105   :  { %v4857_v35 = vadd.f32 %v3401_v39, %v3355_v37 }
 0x106   :  { %v3356_v38 = vpop.f32.mrb[8].mxu0 }
 0x107   :  { %v3402_v43 = vpop.f32.mrb[8].mxu1  ;;  %v3357_v48 = vpop.f32.mrb[9].mxu0 }
 0x108   :  { %v3358_v52 = vadd.f32 %v3357_v48, %v3356_v38  ;;  %v3403_v46 = vpop.f32.mrb[9].mxu1  ;;  %v3359_v55 = vpop.f32.mrb[10].mxu0 }
 0x109   :  { %v3404_v54 = vadd.f32 %v3403_v46, %v3402_v43  ;;  %v3405_v0 = vpop.f32.mrb[10].mxu1  ;;  %v3360_v1 = vpop.f32.mrb[11].mxu0 }
 0x10a   :  { %v3361_v59 = vadd.f32 %v3360_v1, %v3359_v55  ;;  %v3406_v60 = vpop.f32.mrb[11].mxu1 }
 0x10b   :  { %v4865_v61 = vadd.f32 %v3404_v54, %v3358_v52  ;;  %v3407_v3 = vadd.f32 %v3406_v60, %v3405_v0 }
 0x10d   :  { %v4877_v17 = vadd.f32 %v3407_v3, %v3361_v59 }
 0x10e   :  { %v3362_v63 = vpop.f32.mrb[12].mxu0 }
 0x10f   :  { %v3408_v2 = vpop.f32.mrb[12].mxu1  ;;  %v3363_v6 = vpop.f32.mrb[13].mxu0 }
 0x110   :  { %v3364_v16 = vadd.f32 %v3363_v6, %v3362_v63  ;;  %v3409_v19 = vpop.f32.mrb[13].mxu1  ;;  %v3365_v27 = vpop.f32.mrb[14].mxu0 }
 0x111   :  { %v3410_v28 = vadd.f32 %v3409_v19, %v3408_v2  ;;  %v3411_v30 = vpop.f32.mrb[14].mxu1  ;;  %v3366_v32 = vpop.f32.mrb[15].mxu0 }
 0x112   :  { %v3367_v45 = vadd.f32 %v3366_v32, %v3365_v27  ;;  %v3412_v47 = vpop.f32.mrb[15].mxu1 }
 0x113   :  { %v4881_v49 = vadd.f32 %v3410_v28, %v3364_v16  ;;  %v3413_v53 = vadd.f32 %v3412_v47, %v3411_v30 }
 0x115   :  { %v4883_v62 = vadd.f32 %v3413_v53, %v3367_v45 }
 0x116   :  { %v3368_v5 = vpop.f32.mrb[16].mxu0 }
 0x117   :  { %v3414_v7 = vpop.f32.mrb[16].mxu1  ;;  %v3369_v9 = vpop.f32.mrb[17].mxu0 }
 0x118   :  { %v3415_v22 = vpop.f32.mrb[17].mxu1  ;;  %v3371_v23 = vpop.f32.mrb[18].mxu0 }
 0x119   :  { %v3417_v26 = vpop.f32.mrb[18].mxu1  ;;  %v3372_v31 = vpop.f32.mrb[19].mxu0 }
 0x11a   :  { %v3418_v44 = vpop.f32.mrb[19].mxu1 }
 0x11e   :  { %v3436_v50 = vpop.f32.mrb[20].mxu0 }
 0x11f   :  { %v3482_v58 = vpop.f32.mrb[20].mxu1  ;;  %v3437_v8 = vpop.f32.mrb[21].mxu0 }
 0x120   :  { %v3438_v10 = vadd.f32 %v3437_v8, %v3436_v50  ;;  %v3483_v12 = vpop.f32.mrb[21].mxu1  ;;  %v3439_v13 = vpop.f32.mrb[22].mxu0 }
 0x121   :  { %v3484_v15 = vadd.f32 %v3483_v12, %v3482_v58  ;;  %v3485_v18 = vpop.f32.mrb[22].mxu1  ;;  %v3440_v20 = vpop.f32.mrb[23].mxu0 }
 0x122   :  { %v949_v21 = vadd.f32 %v3438_v10, %v4833_v56  ;;  %v3441_v24 = vadd.f32 %v3440_v20, %v3439_v13  ;;  %v3486_v25 = vpop.f32.mrb[23].mxu1 }
 0x123   :  { %v3487_v29 = vadd.f32 %v3486_v25, %v3485_v18 }
 0x124   :  { %v4886_v33 = vadd.f32 %v3484_v15, %v949_v21  ;;  %v952_v34 = vadd.f32 %v3441_v24, %v4841_v11 }
 0x126   :  { %v4889_v37 = vadd.f32 %v3487_v29, %v952_v34  ;;  %v3442_v36 = vpop.f32.mrb[24].mxu0 }
 0x127   :  { %v3488_v39 = vpop.f32.mrb[24].mxu1  ;;  %v3443_v41 = vpop.f32.mrb[25].mxu0 }
 0x128   :  { %v3444_v42 = vadd.f32 %v3443_v41, %v3442_v36  ;;  %v3489_v38 = vpop.f32.mrb[25].mxu1  ;;  %v3445_v43 = vpop.f32.mrb[26].mxu0 }
 0x129   :  { %v3490_v48 = vadd.f32 %v3489_v38, %v3488_v39  ;;  %v3491_v52 = vpop.f32.mrb[26].mxu1  ;;  %v3446_v46 = vpop.f32.mrb[27].mxu0 }
 0x12a   :  { %v957_v56 = vadd.f32 %v3444_v42, %v4849_v40  ;;  %v3447_v55 = vadd.f32 %v3446_v46, %v3445_v43  ;;  %v3492_v57 = vpop.f32.mrb[27].mxu1 }
 0x12b   :  { %v3493_v51 = vadd.f32 %v3492_v57, %v3491_v52 }
 0x12c   :  { %v4892_v54 = vadd.f32 %v3490_v48, %v957_v56  ;;  %v960_v11 = vadd.f32 %v3447_v55, %v4857_v35 }
 0x12e   :  { %v4895_v0 = vadd.f32 %v3493_v51, %v960_v11  ;;  %v3448_v1 = vpop.f32.mrb[28].mxu0 }
 0x12f   :  { %v3494_v59 = vpop.f32.mrb[28].mxu1  ;;  %v3449_v60 = vpop.f32.mrb[29].mxu0 }
 0x130   :  { %v3450_v3 = vadd.f32 %v3449_v60, %v3448_v1  ;;  %v3495_v63 = vpop.f32.mrb[29].mxu1  ;;  %v3451_v2 = vpop.f32.mrb[30].mxu0 }
 0x131   :  { %v3496_v6 = vadd.f32 %v3495_v63, %v3494_v59  ;;  %v3497_v16 = vpop.f32.mrb[30].mxu1  ;;  %v3452_v19 = vpop.f32.mrb[31].mxu0 }
 0x132   :  { %v965_v40 = vadd.f32 %v3450_v3, %v4865_v61  ;;  %v3453_v27 = vadd.f32 %v3452_v19, %v3451_v2  ;;  %v3498_v28 = vpop.f32.mrb[31].mxu1 }
 0x133   :  { %v3499_v30 = vadd.f32 %v3498_v28, %v3497_v16 }
 0x134   :  { %v4898_v32 = vadd.f32 %v3496_v6, %v965_v40  ;;  %v968_v35 = vadd.f32 %v3453_v27, %v4877_v17 }
 0x136   :  { %v4901_v45 = vadd.f32 %v3499_v30, %v968_v35  ;;  %v3454_v47 = vpop.f32.mrb[32].mxu0 }
 0x137   :  { %v3500_v53 = vpop.f32.mrb[32].mxu1  ;;  %v3455_v5 = vpop.f32.mrb[33].mxu0 }
 0x138   :  { %v3456_v7 = vadd.f32 %v3455_v5, %v3454_v47  ;;  %v3501_v9 = vpop.f32.mrb[33].mxu1  ;;  %v3457_v22 = vpop.f32.mrb[34].mxu0 }
 0x139   :  { %v3502_v23 = vadd.f32 %v3501_v9, %v3500_v53  ;;  %v3503_v26 = vpop.f32.mrb[34].mxu1  ;;  %v3458_v31 = vpop.f32.mrb[35].mxu0 }
 0x13a   :  { %v973_v61 = vadd.f32 %v3456_v7, %v4881_v49  ;;  %v3459_v44 = vadd.f32 %v3458_v31, %v3457_v22  ;;  %v3504_v50 = vpop.f32.mrb[35].mxu1 }
 0x13b   :  { %v3505_v58 = vadd.f32 %v3504_v50, %v3503_v26 }
 0x13c   :  { %v4904_v8 = vadd.f32 %v3502_v23, %v973_v61  ;;  %v976_v17 = vadd.f32 %v3459_v44, %v4883_v62 }
 0x13e   :  { %v4907_v10 = vadd.f32 %v3505_v58, %v976_v17  ;;  %v3460_v12 = vpop.f32.mrb[36].mxu0 }
 0x13f   :  { %v3506_v13 = vpop.f32.mrb[36].mxu1  ;;  %v3461_v15 = vpop.f32.mrb[37].mxu0 }
 0x140   :  { %v3507_v18 = vpop.f32.mrb[37].mxu1  ;;  %v3463_v20 = vpop.f32.mrb[38].mxu0 }
 0x141   :  { %v3509_v21 = vpop.f32.mrb[38].mxu1  ;;  %v3464_v24 = vpop.f32.mrb[39].mxu0 }
 0x142   :  { %v3510_v25 = vpop.f32.mrb[39].mxu1 }
 0x146   :  { %v3528_v29 = vpop.f32.mrb[40].mxu0 }
 0x147   :  { %v3574_v34 = vpop.f32.mrb[40].mxu1  ;;  %v3529_v49 = vpop.f32.mrb[41].mxu0 }
 0x148   :  { %v3575_v36 = vpop.f32.mrb[41].mxu1  ;;  %v3531_v39 = vpop.f32.mrb[42].mxu0 }
 0x149   :  { %v3577_v41 = vpop.f32.mrb[42].mxu1  ;;  %v3532_v42 = vpop.f32.mrb[43].mxu0 }
 0x14a   :  { %v3533_v38 = vadd.f32 %v3532_v42, %v3531_v39  ;;  %v3578_v43 = vpop.f32.mrb[43].mxu1 }
 0x14b   :  { %v3579_v62 = vadd.f32 %v3578_v43, %v3577_v41 }
 0x14d   :  { %v4909_v48 = vadd.f32 %v3579_v62, %v3533_v38 }
 0x14e   :  { %v3534_v52 = vpop.f32.mrb[44].mxu0 }
 0x14f   :  { %v3580_v46 = vpop.f32.mrb[44].mxu1  ;;  %v3535_v56 = vpop.f32.mrb[45].mxu0 }
 0x150   :  { %v3536_v55 = vadd.f32 %v3535_v56, %v3534_v52  ;;  %v3581_v57 = vpop.f32.mrb[45].mxu1  ;;  %v3537_v51 = vpop.f32.mrb[46].mxu0 }
 0x151   :  { %v3582_v11 = vadd.f32 %v3581_v57, %v3580_v46  ;;  %v3583_v1 = vpop.f32.mrb[46].mxu1  ;;  %v3538_v59 = vpop.f32.mrb[47].mxu0 }
 0x152   :  { %v3539_v60 = vadd.f32 %v3538_v59, %v3537_v51  ;;  %v3584_v3 = vpop.f32.mrb[47].mxu1 }
 0x153   :  { %v4911_v63 = vadd.f32 %v3582_v11, %v3536_v55  ;;  %v3585_v2 = vadd.f32 %v3584_v3, %v3583_v1 }
 0x155   :  { %v4913_v6 = vadd.f32 %v3585_v2, %v3539_v60 }
 0x156   :  { %v3540_v16 = vpop.f32.mrb[48].mxu0 }
 0x157   :  { %v3586_v19 = vpop.f32.mrb[48].mxu1  ;;  %v3541_v40 = vpop.f32.mrb[49].mxu0 }
 0x158   :  { %v3542_v27 = vadd.f32 %v3541_v40, %v3540_v16  ;;  %v3587_v28 = vpop.f32.mrb[49].mxu1  ;;  %v3543_v30 = vpop.f32.mrb[50].mxu0 }
 0x159   :  { %v3588_v35 = vadd.f32 %v3587_v28, %v3586_v19  ;;  %v3589_v47 = vpop.f32.mrb[50].mxu1  ;;  %v3544_v53 = vpop.f32.mrb[51].mxu0 }
 0x15a   :  { %v3545_v5 = vadd.f32 %v3544_v53, %v3543_v30  ;;  %v3590_v7 = vpop.f32.mrb[51].mxu1 }
 0x15b   :  { %v4915_v9 = vadd.f32 %v3588_v35, %v3542_v27  ;;  %v3591_v22 = vadd.f32 %v3590_v7, %v3589_v47 }
 0x15d   :  { %v4917_v23 = vadd.f32 %v3591_v22, %v3545_v5 }
 0x15e   :  { %v3546_v26 = vpop.f32.mrb[52].mxu0 }
 0x15f   :  { %v3592_v31 = vpop.f32.mrb[52].mxu1  ;;  %v3547_v61 = vpop.f32.mrb[53].mxu0 }
 0x160   :  { %v3548_v44 = vadd.f32 %v3547_v61, %v3546_v26  ;;  %v3593_v50 = vpop.f32.mrb[53].mxu1  ;;  %v3549_v58 = vpop.f32.mrb[54].mxu0 }
 0x161   :  { %v3594_v17 = vadd.f32 %v3593_v50, %v3592_v31  ;;  %v3595_v12 = vpop.f32.mrb[54].mxu1  ;;  %v3550_v13 = vpop.f32.mrb[55].mxu0 }
 0x162   :  { %v3551_v15 = vadd.f32 %v3550_v13, %v3549_v58  ;;  %v3596_v18 = vpop.f32.mrb[55].mxu1 }
 0x163   :  { %v4919_v20 = vadd.f32 %v3594_v17, %v3548_v44  ;;  %v3597_v21 = vadd.f32 %v3596_v18, %v3595_v12 }
 0x165   :  { %v4921_v24 = vadd.f32 %v3597_v21, %v3551_v15 }
 0x166   :  { %v3552_v25 = vpop.f32.mrb[56].mxu0 }
 0x167   :  { %v3598_v29 = vpop.f32.mrb[56].mxu1  ;;  %v3553_v34 = vpop.f32.mrb[57].mxu0 }
 0x168   :  { %v3554_v49 = vadd.f32 %v3553_v34, %v3552_v25  ;;  %v3599_v36 = vpop.f32.mrb[57].mxu1  ;;  %v3555_v39 = vpop.f32.mrb[58].mxu0 }
 0x169   :  { %v3600_v41 = vadd.f32 %v3599_v36, %v3598_v29  ;;  %v3601_v42 = vpop.f32.mrb[58].mxu1  ;;  %v3556_v38 = vpop.f32.mrb[59].mxu0 }
 0x16a   :  { %v3602_v43 = vpop.f32.mrb[59].mxu1 }
 0x16b   :  { %v4923_v62 = vadd.f32 %v3600_v41, %v3554_v49 }
 0x16e   :  { %v3620_v52 = vpop.f32.mrb[60].mxu0 }
 0x16f   :  { %v3666_v46 = vpop.f32.mrb[60].mxu1  ;;  %v3621_v56 = vpop.f32.mrb[61].mxu0 }
 0x170   :  { %v3667_v55 = vpop.f32.mrb[61].mxu1  ;;  %v3623_v57 = vpop.f32.mrb[62].mxu0 }
 0x171   :  { %v3669_v51 = vpop.f32.mrb[62].mxu1  ;;  %v3624_v11 = vpop.f32.mrb[63].mxu0 }
 0x172   :  { %v3625_v1 = vadd.f32 %v3624_v11, %v3623_v57  ;;  %v3670_v59 = vpop.f32.mrb[63].mxu1 }
 0x173   :  { %v3671_v60 = vadd.f32 %v3670_v59, %v3669_v51 }
 0x174   :  { %v1747_v3 = vadd.f32 %v3625_v1, %v4909_v48  ;;  %v4931_v48 = vld [vmem:[%s5188_s3] ss:$0 sm:$0xff] }
 0x176   :  { %v1818_v2 = vadd.f32 %v3671_v60, %v1747_v3  ;;  %v3626_v16 = vpop.f32.mrb[64].mxu0 }
 0x177   :  { %v3672_v19 = vpop.f32.mrb[64].mxu1  ;;  %v3627_v40 = vpop.f32.mrb[65].mxu0 }
 0x178   :  { %v1852_v27 = vadd.f32 %v1818_v2, %v4886_v33  ;;  %v3628_v28 = vadd.f32 %v3627_v40, %v3626_v16  ;;  %v3673_v30 = vpop.f32.mrb[65].mxu1  ;;  %v3629_v35 = vpop.f32.mrb[66].mxu0 }
 0x179   :  { %v3674_v47 = vadd.f32 %v3673_v30, %v3672_v19  ;;  %v3675_v53 = vpop.f32.mrb[66].mxu1  ;;  %v3630_v5 = vpop.f32.mrb[67].mxu0 }
 0x17a   :  { %v1752_v7 = vadd.f32 %v3628_v28, %v4911_v63  ;;  %v3631_v22 = vadd.f32 %v3630_v5, %v3629_v35  ;;  %v3676_v26 = vpop.f32.mrb[67].mxu1  ;;  %v1867_v33 = vadd.f32 %v4931_v48, %v1852_v27 }
 0x17b   :  { %v3677_v31 = vadd.f32 %v3676_v26, %v3675_v53  ;;  %v4018_v53 = vld [vmem:[%s5187_s4 + $0xc8] sm:$0xff]  }
 0x17c   :  { %v1823_v61 = vadd.f32 %v3674_v47, %v1752_v7  ;;  %v1755_v44 = vadd.f32 %v3631_v22, %v4913_v6  ;;  %v1875_v36 = vmax.f32 %v1867_v33, 0.0 }
 0x17e   :  { %v1853_v50 = vadd.f32 %v1823_v61, %v4889_v37  ;;  %v1826_v58 = vadd.f32 %v3677_v31, %v1755_v44  ;;  %v3632_v17 = vpop.f32.mrb[68].mxu0 }
 0x17f   :  { %v3678_v12 = vpop.f32.mrb[68].mxu1  ;;  %v3633_v13 = vpop.f32.mrb[69].mxu0 }
 0x180   :  { %v1868_v63 = vadd.f32 %v4931_v48, %v1853_v50  ;;  %v1854_v15 = vadd.f32 %v1826_v58, %v4892_v54  ;;  %v3634_v18 = vadd.f32 %v3633_v13, %v3632_v17  ;;  %v3679_v21 = vpop.f32.mrb[69].mxu1  ;;  %v3635_v25 = vpop.f32.mrb[70].mxu0  ;;  %v4019_v50 = vld [vmem:[%s5187_s4 + $0x90] sm:$0xff]  }
 0x181   :  { %v3680_v29 = vadd.f32 %v3679_v21, %v3678_v12  ;;  %v3681_v34 = vpop.f32.mrb[70].mxu1  ;;  %v3636_v49 = vpop.f32.mrb[71].mxu0  ;;  %v4021_v21 = vld [vmem:[%s5187_s4 + $0x98] sm:$0xff]  }
 0x182   :  { %v1876_v6 = vmax.f32 %v1868_v63, 0.0  ;;  %v1760_v39 = vadd.f32 %v3634_v18, %v4915_v9  ;;  %v3637_v41 = vadd.f32 %v3636_v49, %v3635_v25  ;;  %v3682_v37 = vpop.f32.mrb[71].mxu1  ;;  %v1869_v54 = vadd.f32 %v4931_v48, %v1854_v15  ;;  %v4022_v25 = vld [vmem:[%s5187_s4 + $0xd8] sm:$0xff]   ;;  %v4023_v49 = vld [vmem:[%s5187_s4 + $0xa0] sm:$0xff]  }
 0x183   :  { %v3683_v42 = vadd.f32 %v3682_v37, %v3681_v34  ;;  %v4027_v37 = vld [vmem:[%s5187_s4 + $0xb0] sm:$0xff]  }
 0x184   :  { %v1831_v38 = vadd.f32 %v3680_v29, %v1760_v39  ;;  %v1763_v43 = vadd.f32 %v3637_v41, %v4917_v23  ;;  %v4940_v52 = vpack.c.bf16 %v1876_v6, %v1875_v36  ;;  %v1877_v16 = vmax.f32 %v1869_v54, 0.0  ;;  %v4024_v36 = vld [vmem:[%s5187_s4 + $0xe0] sm:$0xff]   ;;  %v4026_v41 = vld [vmem:[%s5187_s4 + $0xe8] sm:$0xff]  }
 0x185   :  { %v4031_v54 = vld [vmem:[%s5189_s6] ss:$8 sps:$4 sm:$0xff]  }
 0x186   :  { %v1855_v46 = vadd.f32 %v1831_v38, %v4895_v0  ;;  %v1834_v56 = vadd.f32 %v3683_v42, %v1763_v43  ;;  %v3638_v55 = vpop.f32.mrb[72].mxu0  ;;  %3782 = vmatprep.mubr.bf16.mxu0 %v4940_v52  ;;  %3806 = vmatprep.mubr.bf16.mxu1 %v4940_v52  ;;  %v4028_v42 = vld [vmem:[%s5187_s4 + $0xf0] sm:$0xff]   ;;  %v4029_v38 = vld [vmem:[%s5187_s4 + $0xb8] sm:$0xff]  }
 0x187   :  { %v3639_v57 = vpop.f32.mrb[73].mxu0  ;;  %v3684_v9 = vpop.f32.mrb[72].mxu1  ;;  %v4030_v43 = vld [vmem:[%s5187_s4 + $0xf8] sm:$0xff]  }
 0x188   :  { %v1870_v51 = vadd.f32 %v4931_v48, %v1855_v46  ;;  %v1856_v11 = vadd.f32 %v1834_v56, %v4898_v32  ;;  %v3640_v1 = vadd.f32 %v3639_v57, %v3638_v55  ;;  %v3641_v23 = vpop.f32.mrb[74].mxu0  ;;  %v3685_v59 = vpop.f32.mrb[73].mxu1  ;;  %v4017_v32 = vld [vmem:[%s5187_s4 + $0x88] sm:$0xff]   ;;  %v4034_v46 = vld [vmem:[%s5189_s6 + $0x10] ss:$8 sps:$4 sm:$0xff]  }
 0x189   :  { %v3642_v60 = vpop.f32.mrb[75].mxu0  ;;  %v3686_v3 = vadd.f32 %v3685_v59, %v3684_v9  ;;  %v3687_v2 = vpop.f32.mrb[74].mxu1  ;;  %v4036_v56 = vld [vmem:[%s5189_s6 + $0x14] ss:$8 sps:$4 sm:$0xff]   ;;  %v4037_v55 = vld [vmem:[%s5189_s6 + $0x60] ss:$8 sps:$4 sm:$0xff]  }
 0x18a   :  { %v1878_v0 = vmax.f32 %v1870_v51, 0.0  ;;  %v1768_v19 = vadd.f32 %v3640_v1, %v4919_v20  ;;  %v3643_v40 = vadd.f32 %v3642_v60, %v3641_v23  ;;  %v3688_v27 = vpop.f32.mrb[75].mxu1  ;;  %v1871_v5 = vadd.f32 %v4931_v48, %v1856_v11  ;;  %v4039_v57 = vld [vmem:[%s5189_s6 + $0x64] ss:$8 sps:$4 sm:$0xff]   ;;  %v4040_v51 = vld [vmem:[%s5189_s6 + $0x20] ss:$8 sps:$4 sm:$0xff]  }
 0x18b   :  { %v3689_v28 = vadd.f32 %v3688_v27, %v3687_v2  ;;  %v4042_v9 = vld [vmem:[%s5189_s6 + $0x24] ss:$8 sps:$4 sm:$0xff]   ;;  %v4045_v11 = vld [vmem:[%s5189_s6 + $0x74] ss:$8 sps:$4 sm:$0xff]   ;;  %v4043_v1 = vld [vmem:[%s5189_s6 + $0x70] ss:$8 sps:$4 sm:$0xff]  }
 0x18c   :  { %v4949_v30 = vpack.c.bf16 %v1878_v0, %v1877_v16  ;;  %v1771_v35 = vadd.f32 %v3643_v40, %v4921_v24  ;;  %v1839_v47 = vadd.f32 %v3686_v3, %v1768_v19  ;;  %v1879_v12 = vmax.f32 %v1871_v5, 0.0  ;;  %v4048_v23 = vld [vmem:[%s5189_s6 + $0x34] ss:$8 sps:$4 sm:$0xff]   ;;  %v4046_v59 = vld [vmem:[%s5189_s6 + $0x30] ss:$8 sps:$4 sm:$0xff]  }
 0x18d   :  { %v4051_v60 = vld [vmem:[%s5189_s6 + $0x84] ss:$8 sps:$4 sm:$0xff]   ;;  %v4049_v2 = vld [vmem:[%s5189_s6 + $0x80] ss:$8 sps:$4 sm:$0xff]   ;;  %v4057_v0 = vld [vmem:[%s5189_s6 + $0x94] ss:$8 sps:$4 sm:$0xff]  }
 0x18e   :  { %v1857_v20 = vadd.f32 %v1839_v47, %v4901_v45  ;;  %v1842_v7 = vadd.f32 %v3689_v28, %v1771_v35  ;;  %v3644_v22 = vpop.f32.mrb[76].mxu0  ;;  %3783 = vmatmul.mubr.bf16.vlgmr.msra.gmra.mrb[80].mxu0 %v4949_v30  ;;  %3807 = vmatmul.mubr.bf16.vlgmr.msra.gmra.mrb[80].mxu1 %v4949_v30  ;;  %v4054_v3 = vld [vmem:[%s5189_s6 + $0x44] ss:$8 sps:$4 sm:$0xff]   ;;  %v4052_v16 = vld [vmem:[%s5189_s6 + $0x40] ss:$8 sps:$4 sm:$0xff]  }
 0x18f   :  { %3815 = vmatpush3.bf16.msra.mxu0 %v4870_v4  ;;  %3839 = vmatpush3.bf16.msra.mxu1 %v4875_v14  ;;  %v3645_v24 = vpop.f32.mrb[77].mxu0  ;;  %v3690_v26 = vpop.f32.mrb[76].mxu1  ;;  %v4020_v4 = vld [vmem:[%s5187_s4 + $0xd0] sm:$0xff]   ;;  %v4063_v28 = vld [vmem:[%s5189_s6 + $0xa4] ss:$8 sps:$4 sm:$0xff]  }
 0x190   :  { %v1872_v31 = vadd.f32 %v4931_v48, %v1857_v20  ;;  %v1858_v61 = vadd.f32 %v1842_v7, %v4904_v8  ;;  %v3646_v44 = vadd.f32 %v3645_v24, %v3644_v22  ;;  %v3691_v33 = vpop.f32.mrb[77].mxu1  ;;  %3816 = vmatprep.subr.bf16.mxu0 %v4017_v32  ;;  %3840 = vmatprep.subr.bf16.mxu1 %v4018_v53  ;;  %v3647_v45 = vpop.f32.mrb[78].mxu0  ;;  %v4060_v19 = vld [vmem:[%s5189_s6 + $0x54] ss:$8 sps:$4 sm:$0xff]   ;;  %v4055_v40 = vld [vmem:[%s5189_s6 + $0x90] ss:$8 sps:$4 sm:$0xff]  }
 0x191   :  { %v3692_v14 = vadd.f32 %v3691_v33, %v3690_v26  ;;  %v3648_v58 = vpop.f32.mrb[79].mxu0  ;;  %v3693_v17 = vpop.f32.mrb[78].mxu1  ;;  %v4058_v27 = vld [vmem:[%s5189_s6 + $0x50] ss:$8 sps:$4 sm:$0xff]   ;;  %v4061_v35 = vld [vmem:[%s5189_s6 + $0xa0] ss:$8 sps:$4 sm:$0xff]  }
 0x192   :  { %v1880_v13 = vmax.f32 %v1872_v31, 0.0  ;;  %v1776_v8 = vadd.f32 %v3646_v44, %v4923_v62  ;;  %v3694_v63 = vpop.f32.mrb[79].mxu1  ;;  %v1873_v29 = vadd.f32 %v4931_v48, %v1858_v61  ;;  %v4066_v47 = vld [vmem:[%s5189_s6 + $0xb4] ss:$8 sps:$4 sm:$0xff]  }
 0x193   :  { %3817 = vmatpush3.bf16.msra.mxu0 %v4017_v32  ;;  %3841 = vmatpush3.bf16.msra.mxu1 %v4018_v53  ;;  %v4064_v32 = vld [vmem:[%s5189_s6 + $0xb0] ss:$8 sps:$4 sm:$0xff]   ;;  %v4069_v53 = vld [vmem:[%s5189_s6 + $0xc4] ss:$8 sps:$4 sm:$0xff]  }
 0x194   :  { %v1847_v15 = vadd.f32 %v3692_v14, %v1776_v8  ;;  %3818 = vmatprep.subr.bf16.mxu0 %v4019_v50  ;;  %3842 = vmatprep.subr.bf16.mxu1 %v4020_v4  ;;  %v3326_v18 = vpack.c.bf16 %v1880_v13, %v1879_v12  ;;  %v1881_v6 = vmax.f32 %v1873_v29, 0.0 }
 0x196   :  { %v1859_v34 = vadd.f32 %v1847_v15, %v4907_v10  ;;  %3786 = vmatprep.mubr.bf16.mxu0 %v3326_v18  ;;  %3810 = vmatprep.mubr.bf16.mxu1 %v3326_v18 }
 0x197   :  { %3819 = vmatpush3.bf16.msra.mxu0 %v4019_v50  ;;  %3843 = vmatpush3.bf16.msra.mxu1 %v4020_v4 }
 0x198   :  { %v1874_v62 = vadd.f32 %v4931_v48, %v1859_v34  ;;  %3820 = vmatprep.subr.bf16.mxu0 %v4021_v21  ;;  %3844 = vmatprep.subr.bf16.mxu1 %v4022_v25  ;;  %v4025_v48 = vld [vmem:[%s5187_s4 + $0xa8] sm:$0xff]  }
 0x19a   :  { %v1882_v39 = vmax.f32 %v1874_v62, 0.0  ;;  %v3243_v62 = vld [vmem:[%s5190_s5] ss:$0 sm:$0xff] }
 0x19b   :  { %3821 = vmatpush3.bf16.msra.mxu0 %v4021_v21  ;;  %3845 = vmatpush3.bf16.msra.mxu1 %v4022_v25 }
 0x19c   :  { %3822 = vmatprep.subr.bf16.mxu0 %v4023_v49  ;;  %3846 = vmatprep.subr.bf16.mxu1 %v4024_v36  ;;  %v3327_v10 = vpack.c.bf16 %v1882_v39, %v1881_v6 }
 0x19e   :  { %3787 = vmatmul.mubr.bf16.gmra.mrb[84].mxu0 %v3327_v10  ;;  %3811 = vmatmul.mubr.bf16.gmra.mrb[84].mxu1 %v3327_v10 }
 0x19f   :  { %3823 = vmatpush3.bf16.msra.mxu0 %v4023_v49  ;;  %3847 = vmatpush3.bf16.msra.mxu1 %v4024_v36 }
 0x1a0   :  { %3830 = vmatprep.mubr.bf16.mxu0 %v4940_v52  ;;  %3854 = vmatprep.mubr.bf16.mxu1 %v4940_v52  ;;  %v4033_v52 = vld [vmem:[%s5189_s6 + $0x4] ss:$8 sps:$4 sm:$0xff]  }
 0x1a1   :  { %3824 = vmatprep.subr.bf16.mxu0 %v4025_v48  ;;  %3848 = vmatprep.subr.bf16.mxu1 %v4026_v41 }
 0x1a3   :  { %3825 = vmatpush3.bf16.msra.mxu0 %v4025_v48  ;;  %3849 = vmatpush3.bf16.msra.mxu1 %v4026_v41 }
 0x1a4   :  { %3826 = vmatprep.subr.bf16.mxu0 %v4027_v37  ;;  %3850 = vmatprep.subr.bf16.mxu1 %v4028_v42 }
 0x1a7   :  { %3827 = vmatpush3.bf16.msra.mxu0 %v4027_v37  ;;  %3851 = vmatpush3.bf16.msra.mxu1 %v4028_v42 }
 0x1a8   :  { %3828 = vmatprep.subr.bf16.mxu0 %v4029_v38  ;;  %3852 = vmatprep.subr.bf16.mxu1 %v4030_v43 }
 0x1ab   :  { %3829 = vmatpush3.bf16.msra.mxu0 %v4029_v38  ;;  %3853 = vmatpush3.bf16.msra.mxu1 %v4030_v43 }
 0x1ac   :  { %2626 = vmatprep.subr.bf16.mxu1 %v4033_v52  ;;  %2522 = vmatprep.subr.bf16.mxu0 %v4039_v57 }
 0x1ae   :  { %3831 = vmatmul.mubr.bf16.vlgmr.msra.gmra.mrb[88].mxu0 %v4949_v30  ;;  %3855 = vmatmul.mubr.bf16.vlgmr.msra.gmra.mrb[88].mxu1 %v4949_v30  ;;  %v4101_v30 = vmov 0  }
 0x1af   :  { %3834 = vmatprep.mubr.bf16.mxu0 %v3326_v18  ;;  %3858 = vmatprep.mubr.bf16.mxu1 %v3326_v18 }
 0x1b0   :  { %2627 = vmatpush1.bf16.msra.mxu1 %v4031_v54  ;;  %2523 = vmatpush1.bf16.msra.mxu0 %v4037_v55 }
 0x1b1   :  { %2628 = vmatprep.subr.bf16.mxu1 %v4036_v56  ;;  %2524 = vmatprep.subr.bf16.mxu0 %v4045_v11 }
 0x1b4   :  { %2629 = vmatpush1.bf16.msra.mxu1 %v4034_v46  ;;  %2525 = vmatpush1.bf16.msra.mxu0 %v4043_v1  ;;  %v4067_v1 = vld [vmem:[%s5189_s6 + $0xc0] ss:$8 sps:$4 sm:$0xff]  }
 0x1b5   :  { %2630 = vmatprep.subr.bf16.mxu1 %v4042_v9  ;;  %2526 = vmatprep.subr.bf16.mxu0 %v4051_v60  ;;  %v4070_v60 = vld [vmem:[%s5189_s6 + $0xd0] ss:$8 sps:$4 sm:$0xff]  }
 0x1b6   :  { %3835 = vmatmul.mubr.bf16.gmra.mrb[92].mxu0 %v3327_v10  ;;  %3859 = vmatmul.mubr.bf16.gmra.mrb[92].mxu1 %v3327_v10 }
 0x1b7   :  { %2658 = vmatprep.mubr.bf16.mxu1 %v4101_v30  ;;  %2554 = vmatprep.mubr.bf16.mxu0 %v4101_v30 }
 0x1b8   :  { %2631 = vmatpush1.bf16.msra.mxu1 %v4040_v51  ;;  %2527 = vmatpush1.bf16.msra.mxu0 %v4049_v2  ;;  %v4073_v2 = vld [vmem:[%s5189_s6 + $0xe0] ss:$8 sps:$4 sm:$0xff]  }
 0x1b9   :  { %2632 = vmatprep.subr.bf16.mxu1 %v4048_v23  ;;  %2528 = vmatprep.subr.bf16.mxu0 %v4057_v0  ;;  %v4076_v0 = vld [vmem:[%s5189_s6 + $0xf0] ss:$8 sps:$4 sm:$0xff]  }
 0x1bc   :  { %2633 = vmatpush1.bf16.msra.mxu1 %v4046_v59  ;;  %2529 = vmatpush1.bf16.msra.mxu0 %v4055_v40  ;;  %v4072_v59 = vld [vmem:[%s5189_s6 + $0xd4] ss:$8 sps:$4 sm:$0xff]   ;;  %v4079_v40 = vld [vmem:[%s5189_s6 + $0x100] ss:$8 sps:$4 sm:$0xff]  }
 0x1bd   :  { %2634 = vmatprep.subr.bf16.mxu1 %v4054_v3  ;;  %2530 = vmatprep.subr.bf16.mxu0 %v4063_v28  ;;  %v4075_v3 = vld [vmem:[%s5189_s6 + $0xe4] ss:$8 sps:$4 sm:$0xff]   ;;  %v4084_v28 = vld [vmem:[%s5189_s6 + $0x114] ss:$8 sps:$4 sm:$0xff]  }
 0x1c0   :  { %2635 = vmatpush1.bf16.msra.mxu1 %v4052_v16  ;;  %2531 = vmatpush1.bf16.msra.mxu0 %v4061_v35  ;;  %v4078_v16 = vld [vmem:[%s5189_s6 + $0xf4] ss:$8 sps:$4 sm:$0xff]  }
 0x1c1   :  { %2636 = vmatprep.subr.bf16.mxu1 %v4060_v19  ;;  %2532 = vmatprep.subr.bf16.mxu0 %v4066_v47  ;;  %v4081_v19 = vld [vmem:[%s5189_s6 + $0x104] ss:$8 sps:$4 sm:$0xff]  }
 0x1c4   :  { %2637 = vmatpush1.bf16.msra.mxu1 %v4058_v27  ;;  %2533 = vmatpush1.bf16.msra.mxu0 %v4064_v32  ;;  %v4085_v32 = vld [vmem:[%s5191_s8 + $0x40] sm:$0xff]  }
 0x1c5   :  { %2749 = vmatprep.subr.bf16.mxu0 %v4069_v53  ;;  %v4086_v53 = vld [vmem:[%s5191_s8] sm:$0xff]   ;;  %3744 = vmatprep.subr.bf16.mxu1 %v4085_v32 }
 0x261   :  { %v3784_v5 = vpop.f32.mrb[80].mxu0  ;;  %v3808_v20 = vpop.f32.mrb[80].mxu1 }
 0x262   :  { %v2013_v7 = vpop.f32.mrb[81].mxu0  ;;  %v2138_v22 = vpop.f32.mrb[81].mxu1  ;;  %v4088_v20 = vld [vmem:[%s5191_s8 + $0x8] sm:$0xff]  }
 0x263   :  { %v3785_v24 = vpop.f32.mrb[82].mxu0  ;;  %v3809_v26 = vpop.f32.mrb[82].mxu1  ;;  %v4090_v22 = vld [vmem:[%s5191_s8 + $0x10] sm:$0xff]  }
 0x264   :  { %v2439_v31 = vadd.f32 %v3809_v26, %v3784_v5  ;;  %v2016_v61 = vpop.f32.mrb[83].mxu0  ;;  %v2140_v44 = vpop.f32.mrb[83].mxu1  ;;  %v4087_v5 = vld [vmem:[%s5191_s8 + $0x48] sm:$0xff]   ;;  %v4091_v24 = vld [vmem:[%s5191_s8 + $0x58] sm:$0xff]  }
 0x265   :  { %v2414_v33 = vadd.f32 %v2140_v44, %v2013_v7  ;;  %v4089_v7 = vld [vmem:[%s5191_s8 + $0x50] sm:$0xff]   ;;  %v4092_v26 = vld [vmem:[%s5191_s8 + $0x18] sm:$0xff]   ;;  %v4094_v61 = vld [vmem:[%s5191_s8 + $0x20] sm:$0xff]  }
 0x266   :  { %v4095_v44 = vld [vmem:[%s5191_s8 + $0x68] sm:$0xff]  }
 0x271   :  { %v3788_v45 = vpop.f32.mrb[84].mxu0  ;;  %v3812_v50 = vpop.f32.mrb[84].mxu1 }
 0x272   :  { %v2027_v4 = vpop.f32.mrb[85].mxu0  ;;  %v2152_v14 = vpop.f32.mrb[85].mxu1  ;;  %v4097_v45 = vld [vmem:[%s5191_s8 + $0x70] sm:$0xff]  }
 0x273   :  { %v3789_v58 = vpop.f32.mrb[86].mxu0  ;;  %v3813_v17 = vpop.f32.mrb[86].mxu1  ;;  %v4098_v50 = vld [vmem:[%s5191_s8 + $0x30] sm:$0xff]   ;;  %v4100_v14 = vld [vmem:[%s5191_s8 + $0x38] sm:$0xff]  }
 0x274   :  { %v2030_v12 = vpop.f32.mrb[87].mxu0  ;;  %v2154_v13 = vpop.f32.mrb[87].mxu1 }
 0x275   :  { %v2667_v8 = vadd.f32 %v2154_v13, %v2027_v4  ;;  %v4099_v4 = vld [vmem:[%s5191_s8 + $0x78] sm:$0xff]  }
 0x281   :  { %v3832_v63 = vpop.f32.mrb[88].mxu0  ;;  %v3856_v15 = vpop.f32.mrb[88].mxu1 }
 0x282   :  { %v2415_v18 = vadd.f32 %v3832_v63, %v2414_v33  ;;  %v2263_v21 = vpop.f32.mrb[89].mxu0  ;;  %v2388_v25 = vpop.f32.mrb[89].mxu1  ;;  %v4096_v33 = vld [vmem:[%s5191_s8 + $0x28] sm:$0xff]  }
 0x283   :  { %v3833_v29 = vpop.f32.mrb[90].mxu0  ;;  %v3857_v34 = vpop.f32.mrb[90].mxu1 }
 0x284   :  { %v2416_v49 = vadd.f32 %v3857_v34, %v2415_v18  ;;  %v2265_v36 = vpop.f32.mrb[91].mxu0  ;;  %v2390_v6 = vpop.f32.mrb[91].mxu1  ;;  %v2794_v29 = vlaneseq }
 0x286   :  { %v2424_v39 = vadd.f32 %v3243_v62, %v2416_v49  ;;  %v2795_v34 = vshrl.u32 %v2794_v29, 7  ;;  %v2792_v49 = vld [vmem:[%s5192_s7] sm:$0x3] }
 0x288   :  { %v2425_v10 = vmax.f32 %v2424_v39, 0.0  ;;  %v2800_v36 = vsub.s32 1, %v2795_v34 }
 0x289   :  { %v3836_v48 = vpop.f32.mrb[92].mxu0  ;;  %v3860_v41 = vpop.f32.mrb[92].mxu1 }
 0x28a   :  { %v2426_v37 = vpack.c.bf16 %v2425_v10, %v2425_v10  ;;  %v2668_v42 = vadd.f32 %v3836_v48, %v2667_v8  ;;  %v2276_v38 = vpop.f32.mrb[93].mxu0  ;;  %v2401_v43 = vpop.f32.mrb[93].mxu1  ;;  %v2801_v10 = vrot.slane %v2792_v49, %v2800_v36 }
 0x28b   :  { %v2440_v52 = vadd.f32 %v2439_v31, %v2276_v38  ;;  %v3837_v54 = vpop.f32.mrb[94].mxu0  ;;  %v3861_v46 = vpop.f32.mrb[94].mxu1  ;;  %v4093_v31 = vld [vmem:[%s5191_s8 + $0x60] sm:$0xff]  }
 0x28c   :  { %v2669_v56 = vadd.f32 %v3861_v46, %v2668_v42  ;;  %v2279_v55 = vpop.f32.mrb[95].mxu0  ;;  %v2403_v57 = vpop.f32.mrb[95].mxu1  ;;  %3281 = vmatmul.mubr.msk.bf16.vlgmr.msra.gmra.mrb[96].mxu1 %vm2518_vm0, %v2426_v37 }
 0x28d   :  { %v2441_v9 = vadd.f32 %v2440_v52, %v2403_v57  ;;  %3745 = vmatpush3.bf16.msra.mxu1 %v4086_v53 }
 0x28e   :  { %v2670_v27 = vadd.f32 %v3243_v62, %v2669_v56  ;;  %3746 = vmatprep.subr.bf16.mxu1 %v4087_v5 }
 0x28f   :  { %v2442_v51 = vadd.f32 %v3243_v62, %v2441_v9  ;;  %v2796_v62 = vsub.s32 0, %v2795_v34  ;;  %v3307_v9 = vld [vmem:[%s5193_s9] ss:$0 sm:$0xff] }
 0x290   :  { %v2671_v35 = vmax.f32 %v2670_v27, 0.0 }
 0x291   :  { %v2443_v11 = vmax.f32 %v2442_v51, 0.0  ;;  %3747 = vmatpush3.bf16.msra.mxu1 %v4088_v20  ;;  %v2797_v6 = vrot.slane %v2792_v49, %v2796_v62 }
 0x292   :  { %v2672_v47 = vpack.c.bf16 %v2671_v35, %v2671_v35  ;;  %3748 = vmatprep.subr.bf16.mxu1 %v4089_v7 }
 0x293   :  { %v2444_v23 = vpack.c.bf16 %v2443_v11, %v2443_v11 }
 0x295   :  { %3268 = vmatmul.mubr.msk.bf16.vlgmr.msra.gmra.mrb[96].mxu0 %vm2518_vm0, %v2444_v23  ;;  %3749 = vmatpush3.bf16.msra.mxu1 %v4090_v22 }
 0x296   :  { %2750 = vmatpush1.bf16.msra.mxu0 %v4067_v1  ;;  %2781 = vmatprep.mubr.bf16.mxu0 %v4101_v30  ;;  %v4082_v30 = vld [vmem:[%s5189_s6 + $0x110] ss:$8 sps:$4 sm:$0xff]  }
 0x297   :  { %2751 = vmatprep.subr.bf16.mxu0 %v4072_v59  ;;  %3750 = vmatprep.subr.bf16.mxu1 %v4091_v24 }
 0x299   :  { %3751 = vmatpush3.bf16.msra.mxu1 %v4092_v26 }
 0x29a   :  { %2752 = vmatpush1.bf16.msra.mxu0 %v4070_v60  ;;  %3752 = vmatprep.subr.bf16.mxu1 %v4093_v31 }
 0x29b   :  { %2753 = vmatprep.subr.bf16.mxu0 %v4075_v3 }
 0x29d   :  { %3753 = vmatpush3.bf16.msra.mxu1 %v4094_v61 }
 0x29e   :  { %2754 = vmatpush1.bf16.msra.mxu0 %v4073_v2  ;;  %3754 = vmatprep.subr.bf16.mxu1 %v4095_v44 }
 0x29f   :  { %2755 = vmatprep.subr.bf16.mxu0 %v4078_v16 }
 0x2a1   :  { %3755 = vmatpush3.bf16.msra.mxu1 %v4096_v33 }
 0x2a2   :  { %2756 = vmatpush1.bf16.msra.mxu0 %v4076_v0  ;;  %3756 = vmatprep.subr.bf16.mxu1 %v4097_v45 }
 0x2a3   :  { %2757 = vmatprep.subr.bf16.mxu0 %v4081_v19 }
 0x2a5   :  { %3757 = vmatpush3.bf16.msra.mxu1 %v4098_v50 }
 0x2a6   :  { %2758 = vmatpush1.bf16.msra.mxu0 %v4079_v40  ;;  %3758 = vmatprep.subr.bf16.mxu1 %v4099_v4 }
 0x2a7   :  { %2759 = vmatprep.subr.bf16.mxu0 %v4084_v28 }
 0x2a9   :  { %3759 = vmatpush3.bf16.msra.mxu1 %v4100_v14 }
 0x2aa   :  { %2760 = vmatpush1.bf16.msra.mxu0 %v4082_v30 }
 0x2ad   :  { %3306 = vmatmul.mubr.msk.bf16.vlgmr.msra.gmra.mrb[100].mxu0 %vm2518_vm0, %v2672_v47 }
 0x35f   :  { %v2660_v58 = vpop.f32.mrb[96].mxu1 }
 0x360   :  { %v2662_v17 = vpop.f32.mrb[97].mxu1 }
 0x361   :  { %v2664_v12 = vpop.f32.mrb[98].mxu1 }
 0x362   :  { %v2665_v13 = vpop.f32.mrb[99].mxu1 }
 0x368   :  { %v2556_v8 = vpop.f32.mrb[96].mxu0 }
 0x369   :  { %v2661_v63 = vadd.f32 %v2660_v58, %v2556_v8  ;;  %v2558_v15 = vpop.f32.mrb[97].mxu0 }
 0x36a   :  { %v2663_v18 = vadd.f32 %v2662_v17, %v2558_v15  ;;  %v2560_v21 = vpop.f32.mrb[98].mxu0 }
 0x36b   :  { %v2561_v25 = vpop.f32.mrb[99].mxu0 }
 0x380   :  { %v2783_v39 = vpop.f32.mrb[100].mxu0 }
 0x381   :  { %v2790_v48 = vadd.f32 %v2783_v39, %v2661_v63  ;;  %v2785_v41 = vpop.f32.mrb[101].mxu0 }
 0x382   :  { %v2791_v37 = vadd.f32 %v2785_v41, %v2663_v18  ;;  %v2787_v42 = vpop.f32.mrb[102].mxu0 }
 0x383   :  { %v2804_v38 = vadd.f32 %v2797_v6, %v2790_v48  ;;  %v2788_v43 = vpop.f32.mrb[103].mxu0 }
 0x384   :  { %v2805_v52 = vadd.f32 %v2801_v10, %v2791_v37 }
 0x385   :  { %v2806_v54 = vmax.f32 %v2804_v38, 0.0 }
 0x386   :  { %v2807_v46 = vmax.f32 %v2805_v52, 0.0 }
 0x387   :  { %v2808_v55 = vpack.c.bf16 %v2806_v54, %v2806_v54 }
 0x388   :  { %v2809_v56 = vpack.c.bf16 %v2807_v46, %v2807_v46 }
 0x38a   :  { %2977 = vmatprep.mubr.bf16.mxu1 %v2809_v56 }
 0x38b   :  { %2978 = vmatmul.mubr.bf16.vlgmr.msra.gmra.mrb[100].mxu1 %v2808_v55 }
 0x45e   :  { %v3760_v57 = vpop.f32.mrb[100].mxu1 }
 0x45f   :  { %v3761_v51 = vpop.f32.mrb[101].mxu1 }
 0x460   :  { %v3762_v11 = vadd.f32 %v3761_v51, %v3760_v57  ;;  %v3763_v1 = vpop.f32.mrb[102].mxu1 }
 0x461   :  { %v3764_v23 = vpop.f32.mrb[103].mxu1 }
 0x462   :  { %v2980_v59 = vadd.f32 %v3762_v11, %v3307_v9 }
 0x464   :  { %2985 = vst [vmem:[%s5194_s10] sm:$0xff] %v2980_v59 }

</bundles_post_ra>
